<compile_context>
chip_gen: v5e
topology: v5e:2x2
jax: 0.10.0
libtpu: 0.0.40
codegen_flags: <defaults>
</compile_context>

<pallas_src>
import math

import jax
import jax.numpy as jnp
from jax.experimental import pallas as pl
from jax.experimental.pallas import tpu as pltpu

EPS = 1e-5
LANE = 128
SUB = 8


# ----------------------------------------------------------------------------
# small helpers
# ----------------------------------------------------------------------------
def _round_up(n, m):
    return ((n + m - 1) // m) * m


def _pick_tile(m, target=1024):
    """Return (TM, Mp): an 8-multiple row tile and the (possibly padded) M."""
    cap = min(target, _round_up(m, SUB))
    cap -= cap % SUB
    for t in range(cap, SUB - 1, -SUB):
        if m % t == 0:
            return t, m
    t = min(512, cap)
    return t, _round_up(m, t)


def _bytes(shape, dtype):
    return math.prod(shape) * jnp.dtype(dtype).itemsize


def _compiler_params(sem, block_bytes, scratch_bytes=0):
    """dimension_semantics + explicit VMEM budget (double-buffer + headroom)."""
    need = 2 * block_bytes + scratch_bytes + (2 << 20)
    limit = int(min(max(need, 16 << 20), 40 << 20))
    if need > limit:            # never request less than the estimated need
        limit = int(need)
    return pltpu.CompilerParams(dimension_semantics=sem,
                                vmem_limit_bytes=limit)


def _reduce_stats(p):
    """(G, 8, C) per-block partial sums (broadcast over 8 sublanes) -> (1, C)."""
    return jnp.sum(p, axis=(0, 1))[None, :] / 8.0


def _scale_shift(s_p, sq_p, gamma, beta, count):
    """Fold training-mode BN into per-channel scale/shift: bn(y) = scale*y + shift."""
    s, sq = _reduce_stats(s_p), _reduce_stats(sq_p)
    mean = s / count
    var = jnp.maximum(sq / count - mean * mean, 0.0)   # biased variance (torch BN)
    scale = gamma * jax.lax.rsqrt(var + EPS)
    shift = beta - mean * scale
    return scale, shift


# ----------------------------------------------------------------------------
# Pallas kernels
# ----------------------------------------------------------------------------
def _conv1x1_stats_kernel(x_ref, w_ref, y_ref, s_ref, sq_ref):
    """y = x @ w (bf16 operands, f32 acc); per-block channel sum / sum-of-squares."""
    acc = jnp.dot(x_ref[...].astype(jnp.bfloat16), w_ref[...],
                  preferred_element_type=jnp.float32)
    y_ref[...] = acc.astype(y_ref.dtype)
    c = s_ref.shape[-1]
    s_ref[...] = jnp.broadcast_to(jnp.sum(acc, axis=0)[None, None, :], (1, SUB, c))
    sq_ref[...] = jnp.broadcast_to(jnp.sum(acc * acc, axis=0)[None, None, :], (1, SUB, c))


def _make_bn_relu_conv3x3_kernel(H, W):
    """a = relu(scale*y1 + shift); y2 = conv3x3(a, pad=1) via a lane-stacked
    row-halo slab and 3 MXU matmuls; per-image channel stats of y2."""
    HW = H * W

    def kernel(y1_ref, w2_ref, scale_ref, shift_ref,
               y2_ref, s_ref, sq_ref, apad_ref, acc_ref):
        c = scale_ref.shape[-1]
        # BN1 (folded) + ReLU in f32.
        a = jnp.maximum(y1_ref[...].astype(jnp.float32) * scale_ref[...]
                        + shift_ref[...], 0.0)                       # (HW, C)

        # Slab layout: rows [0,W) and [(H+1)W,(H+2)W) are a zero halo (kh taps),
        # lanes [C,2C) = a, [0,C) = a shifted right along W, [2C,3C) = shifted left.
        apad_ref[0:W, :] = jnp.zeros((W, 3 * c), jnp.float32)
        apad_ref[(H + 1) * W:(H + 2) * W, :] = jnp.zeros((W, 3 * c), jnp.float32)
        apad_ref[W:W + HW, c:2 * c] = a

        col = jax.lax.broadcasted_iota(jnp.int32, (HW, 1), 0) % W
        a_m = jnp.where(col == 0, 0.0,
                        apad_ref[W - 1:W - 1 + HW, c:2 * c])   # a[h, w-1]
        a_p = jnp.where(col == W - 1, 0.0,
                        apad_ref[W + 1:W + 1 + HW, c:2 * c])   # a[h, w+1]
        apad_ref[W:W + HW, 0:c] = a_m
        apad_ref[W:W + HW, 2 * c:3 * c] = a_p

        # conv3x3 = 3 matmuls (one per kh), each contracting over 3*C lanes.
        for kh in range(3):
            patch = apad_ref[kh * W:kh * W + HW, :]
            term = jnp.dot(patch.astype(jnp.bfloat16), w2_ref[kh],
                           preferred_element_type=jnp.float32)
            if kh == 0:
                acc_ref[...] = term
            else:
                acc_ref[...] += term

        acc = acc_ref[...]
        y2_ref[...] = acc.astype(y2_ref.dtype)
        s_ref[...] = jnp.broadcast_to(jnp.sum(acc, axis=0)[None, None, :], (1, SUB, c))
        sq_ref[...] = jnp.broadcast_to(jnp.sum(acc * acc, axis=0)[None, None, :], (1, SUB, c))

    return kernel


def _make_bn_relu_conv1x1_kernel(tm, valid_rows):
    """a = relu(scale*y + shift); o = a @ w; per-block channel stats of o."""
    def kernel(y_ref, w_ref, scale_ref, shift_ref, o_ref, s_ref, sq_ref):
        c = s_ref.shape[-1]
        a = jnp.maximum(y_ref[...].astype(jnp.float32) * scale_ref[...]
                        + shift_ref[...], 0.0)
        if valid_rows is not None:   # zero padded tail rows so stats stay exact
            row = (pl.program_id(0) * tm
                   + jax.lax.broadcasted_iota(jnp.int32, (tm, 1), 0))
            a = jnp.where(row < valid_rows, a, 0.0)
        acc = jnp.dot(a.astype(jnp.bfloat16), w_ref[...],
                      preferred_element_type=jnp.float32)
        o_ref[...] = acc.astype(o_ref.dtype)
        s_ref[...] = jnp.broadcast_to(jnp.sum(acc, axis=0)[None, None, :], (1, SUB, c))
        sq_ref[...] = jnp.broadcast_to(jnp.sum(acc * acc, axis=0)[None, None, :], (1, SUB, c))
    return kernel


def _bn_add_relu_kernel(y_ref, scale_ref, shift_ref, res_ref, o_ref):
    """o = relu(scale*y + shift + residual); lane-dense (padded channels kept)."""
    o_ref[...] = jnp.maximum(
        y_ref[...].astype(jnp.float32) * scale_ref[...] + shift_ref[...]
        + res_ref[...], 0.0).astype(o_ref.dtype)


# ----------------------------------------------------------------------------
# Bottleneck forward (Pallas)
# ----------------------------------------------------------------------------
def bottleneck_forward(x_nchw, params):
    """x_nchw: (N, inplanes, H, W) f32.  Returns (N, planes*4, H, W) f32."""
    w1, g1, b1, w2, g2, b2, w3, g3, b3 = params
    N, Cin, H, W = x_nchw.shape
    width = w1.shape[0]
    Cout = w3.shape[0]
    if Cin != Cout:
        raise NotImplementedError(
            "identity residual requires inplanes == planes * expansion")
    if W % SUB != 0:
        # TODO(synk): spatial padding / row-tiling for W not a multiple of 8.
        raise NotImplementedError("W must be a multiple of 8")

    M = N * H * W
    HW = H * W
    Cin_p = _round_up(Cin, LANE)
    Wd_p = _round_up(width, LANE)
    Cout_p = _round_up(Cout, LANE)

    TM, Mp = _pick_tile(M)
    Gm = Mp // TM

    # NCHW -> flat NHWC rows; channels zero-padded to the lane width, rows to Mp.
    # x_flat doubles as the (lane-dense) residual for stage 4.
    x_flat = jnp.pad(
        jnp.transpose(x_nchw, (0, 2, 3, 1)).astype(jnp.float32).reshape(M, Cin),
        ((0, Mp - M), (0, Cin_p - Cin)))

    # Weights as channels-last matmul matrices (bf16, zero-padded to lane multiples).
    w1m = jnp.pad(w1.reshape(width, Cin).T,
                  ((0, Cin_p - Cin), (0, Wd_p - width))).astype(jnp.bfloat16)
    w2m = jnp.pad(jnp.transpose(w2, (2, 3, 1, 0)),            # (kh, kw, I, O)
                  ((0, 0), (0, 0), (0, Wd_p - width), (0, Wd_p - width)))
    w2m = w2m.reshape(3, 3 * Wd_p, Wd_p).astype(jnp.bfloat16)  # kw stacked on rows
    w3m = jnp.pad(w3.reshape(Cout, width).T,
                  ((0, Wd_p - width), (0, Cout_p - Cout))).astype(jnp.bfloat16)

    pad1 = lambda v, c: jnp.pad(v.astype(jnp.float32).reshape(1, -1),
                                ((0, 0), (0, c - v.shape[0])))
    g1p, b1p = pad1(g1, Wd_p), pad1(b1, Wd_p)
    g2p, b2p = pad1(g2, Wd_p), pad1(b2, Wd_p)
    g3p, b3p = pad1(g3, Cout_p), pad1(b3, Cout_p)

    par = ("parallel",)

    # ---- stage 1: conv1 (1x1) + BN1 partial stats ----------------------------
    blocks1 = (_bytes((TM, Cin_p), jnp.float32) + _bytes((Cin_p, Wd_p), jnp.bfloat16)
               + _bytes((TM, Wd_p), jnp.bfloat16)
               + 2 * _bytes((1, SUB, Wd_p), jnp.float32))
    y1, s1, sq1 = pl.pallas_call(
        _conv1x1_stats_kernel,
        out_shape=(jax.ShapeDtypeStruct((Mp, Wd_p), jnp.bfloat16),
                   jax.ShapeDtypeStruct((Gm, SUB, Wd_p), jnp.float32),
                   jax.ShapeDtypeStruct((Gm, SUB, Wd_p), jnp.float32)),
        grid=(Gm,),
        in_specs=[pl.BlockSpec((TM, Cin_p), lambda i: (i, 0)),
                  pl.BlockSpec((Cin_p, Wd_p), lambda i: (0, 0))],
        out_specs=(pl.BlockSpec((TM, Wd_p), lambda i: (i, 0)),
                   pl.BlockSpec((1, SUB, Wd_p), lambda i: (i, 0, 0)),
                   pl.BlockSpec((1, SUB, Wd_p), lambda i: (i, 0, 0))),
        compiler_params=_compiler_params(par, blocks1),
    )(x_flat, w1m)
    scale1, shift1 = _scale_shift(s1, sq1, g1p, b1p, float(M))

    # ---- stage 2: BN1+ReLU -> conv2 (3x3, pad=1) + BN2 partial stats ---------
    # TODO(synk): row-tile this stage (grid=(N, H//TH) with a halo) for very
    #             large H*W*width working sets.
    blocks2 = (2 * _bytes((HW, Wd_p), jnp.bfloat16)
               + _bytes((3, 3 * Wd_p, Wd_p), jnp.bfloat16)
               + 2 * _bytes((1, Wd_p), jnp.float32)
               + 2 * _bytes((1, SUB, Wd_p), jnp.float32))
    scratch2 = (_bytes(((H + 2) * W, 3 * Wd_p), jnp.float32)
                + _bytes((HW, Wd_p), jnp.float32))
    y2, s2, sq2 = pl.pallas_call(
        _make_bn_relu_conv3x3_kernel(H, W),
        out_shape=(jax.ShapeDtypeStruct((M, Wd_p), jnp.bfloat16),
                   jax.ShapeDtypeStruct((N, SUB, Wd_p), jnp.float32),
                   jax.ShapeDtypeStruct((N, SUB, Wd_p), jnp.float32)),
        grid=(N,),
        in_specs=[pl.BlockSpec((HW, Wd_p), lambda n: (n, 0)),
                  pl.BlockSpec((3, 3 * Wd_p, Wd_p), lambda n: (0, 0, 0)),
                  pl.BlockSpec((1, Wd_p), lambda n: (0, 0)),
                  pl.BlockSpec((1, Wd_p), lambda n: (0, 0))],
        out_specs=(pl.BlockSpec((HW, Wd_p), lambda n: (n, 0)),
                   pl.BlockSpec((1, SUB, Wd_p), lambda n: (n, 0, 0)),
                   pl.BlockSpec((1, SUB, Wd_p), lambda n: (n, 0, 0))),
        scratch_shapes=[pltpu.VMEM(((H + 2) * W, 3 * Wd_p), jnp.float32),
                        pltpu.VMEM((HW, Wd_p), jnp.float32)],
        compiler_params=_compiler_params(par, blocks2, scratch2),
    )(y1, w2m, scale1, shift1)
    scale2, shift2 = _scale_shift(s2, sq2, g2p, b2p, float(M))

    # ---- stage 3: BN2+ReLU -> conv3 (1x1) + BN3 partial stats ----------------
    y2f = y2 if Mp == M else jnp.pad(y2, ((0, Mp - M), (0, 0)))
    valid_rows = None if Mp == M else M
    blocks3 = (_bytes((TM, Wd_p), jnp.bfloat16) + _bytes((Wd_p, Cout_p), jnp.bfloat16)
               + 2 * _bytes((1, Wd_p), jnp.float32) + _bytes((TM, Cout_p), jnp.bfloat16)
               + 2 * _bytes((1, SUB, Cout_p), jnp.float32))
    y3, s3, sq3 = pl.pallas_call(
        _make_bn_relu_conv1x1_kernel(TM, valid_rows),
        out_shape=(jax.ShapeDtypeStruct((Mp, Cout_p), jnp.bfloat16),
                   jax.ShapeDtypeStruct((Gm, SUB, Cout_p), jnp.float32),
                   jax.ShapeDtypeStruct((Gm, SUB, Cout_p), jnp.float32)),
        grid=(Gm,),
        in_specs=[pl.BlockSpec((TM, Wd_p), lambda i: (i, 0)),
                  pl.BlockSpec((Wd_p, Cout_p), lambda i: (0, 0)),
                  pl.BlockSpec((1, Wd_p), lambda i: (0, 0)),
                  pl.BlockSpec((1, Wd_p), lambda i: (0, 0))],
        out_specs=(pl.BlockSpec((TM, Cout_p), lambda i: (i, 0)),
                   pl.BlockSpec((1, SUB, Cout_p), lambda i: (i, 0, 0)),
                   pl.BlockSpec((1, SUB, Cout_p), lambda i: (i, 0, 0))),
        compiler_params=_compiler_params(par, blocks3),
    )(y2f, w3m, scale2, shift2)
    scale3, shift3 = _scale_shift(s3, sq3, g3p, b3p, float(M))

    # ---- stage 4: BN3 apply + residual add + ReLU (lane-dense) ---------------
    blocks4 = (_bytes((TM, Cout_p), jnp.bfloat16) + 2 * _bytes((1, Cout_p), jnp.float32)
               + 2 * _bytes((TM, Cout_p), jnp.float32))
    out_flat = pl.pallas_call(
        _bn_add_relu_kernel,
        out_shape=jax.ShapeDtypeStruct((Mp, Cout_p), jnp.float32),
        grid=(Gm,),
        in_specs=[pl.BlockSpec((TM, Cout_p), lambda i: (i, 0)),
                  pl.BlockSpec((1, Cout_p), lambda i: (0, 0)),
                  pl.BlockSpec((1, Cout_p), lambda i: (0, 0)),
                  pl.BlockSpec((TM, Cout_p), lambda i: (i, 0))],
        out_specs=pl.BlockSpec((TM, Cout_p), lambda i: (i, 0)),
        compiler_params=_compiler_params(par, blocks4),
    )(y3, scale3, shift3, x_flat)

    out = out_flat[:M, :Cout].reshape(N, H, W, Cout)
    return jnp.transpose(out, (0, 3, 1, 2))


# ----------------------------------------------------------------------------
# Pure-JAX reference (f32) for the correctness check
# ----------------------------------------------------------------------------
def _bn_train(y, g, b):
    mean = jnp.mean(y, axis=(0, 2, 3), keepdims=True)
    var = jnp.mean((y - mean) ** 2, axis=(0, 2, 3), keepdims=True)
    return ((y - mean) * jax.lax.rsqrt(var + EPS) * g.reshape(1, -1, 1, 1)
            + b.reshape(1, -1, 1, 1))


def bottleneck_reference(x, params):
    w1, g1, b1, w2, g2, b2, w3, g3, b3 = params
    conv = lambda a, w, pad: jax.lax.conv_general_dilated(
        a, w, (1, 1), pad, dimension_numbers=("NCHW", "OIHW", "NCHW"))
    out = jax.nn.relu(_bn_train(conv(x, w1, "VALID"), g1, b1))
    out = jax.nn.relu(_bn_train(conv(out, w2, [(1, 1), (1, 1)]), g2, b2))
    out = _bn_train(conv(out, w3, "VALID"), g3, b3) + x
    return jax.nn.relu(out)


# ----------------------------------------------------------------------------
if __name__ == "__main__":
    # Bottleneck(inplanes=32, planes=8): width = 8, output channels = 32.
    N, H, W = 2, 8, 8
    inplanes, planes = 32, 8
    width = planes
    outc = planes * 4

    key = jax.random.PRNGKey(0)
    keys = jax.random.split(key, 10)
    x = jax.random.normal(keys[0], (N, inplanes, H, W), jnp.float32)

    w1 = jax.random.normal(keys[1], (width, inplanes, 1, 1), jnp.float32) * 0.1
    w2 = jax.random.normal(keys[2], (width, width, 3, 3), jnp.float32) * 0.1
    w3 = jax.random.normal(keys[3], (outc, width, 1, 1), jnp.float32) * 0.1
    g1 = 1.0 + 0.1 * jax.random.normal(keys[4], (width,), jnp.float32)
    b1 = 0.1 * jax.random.normal(keys[5], (width,), jnp.float32)
    g2 = 1.0 + 0.1 * jax.random.normal(keys[6], (width,), jnp.float32)
    b2 = 0.1 * jax.random.normal(keys[7], (width,), jnp.float32)
    g3 = 1.0 + 0.1 * jax.random.normal(keys[8], (outc,), jnp.float32)
    b3 = 0.1 * jax.random.normal(keys[9], (outc,), jnp.float32)
    params = (w1, g1, b1, w2, g2, b2, w3, g3, b3)

    fwd = jax.jit(bottleneck_forward)
    out = jax.block_until_ready(fwd(x, params))
    ref = jax.block_until_ready(bottleneck_reference(x, params))

    assert out.shape == (N, outc, H, W), out.shape
    err = float(jnp.max(jnp.abs(out - ref)))
    # bf16 intermediates / matmul operands -> relaxed (but still tight) check.
    assert jnp.allclose(out, ref, atol=5e-2, rtol=5e-2), f"max abs err = {err}"

    print("KERNEL_OK")
</pallas_src>

<mosaic_0001>
module attributes {stable_mosaic.version = 11 : i64} {
  func.func @_conv1x1_stats_kernel(%arg0: i32, %arg1: memref<128x128xf32, #tpu.memory_space<vmem>>, %arg2: memref<128x128xbf16, #tpu.memory_space<vmem>>, %arg3: memref<128x128xbf16, #tpu.memory_space<vmem>>, %arg4: memref<1x8x128xf32, #tpu.memory_space<vmem>>, %arg5: memref<1x8x128xf32, #tpu.memory_space<vmem>>) attributes {dimension_semantics = [#tpu.dimension_semantics<parallel>], iteration_bounds = array<i64: 1>, scalar_prefetch = 0 : i64, scratch_operands = 0 : i64, tpu.core_type = #tpu.core_type<tc>, window_params = [{transform_indices = @transform_0, window_bounds = array<i64: 128, 128>}, {pipeline_mode = #tpu.pipeline_mode<synchronous>, transform_indices = @transform_1, window_bounds = array<i64: 128, 128>}, {transform_indices = @transform_2, window_bounds = array<i64: 128, 128>}, {transform_indices = @transform_3, window_bounds = array<i64: 1, 8, 128>}, {transform_indices = @transform_4, window_bounds = array<i64: 1, 8, 128>}]} {
    %c0 = arith.constant 0 : index
    %c0_0 = arith.constant 0 : index
    %0 = vector.load %arg1[%c0, %c0_0] : memref<128x128xf32, #tpu.memory_space<vmem>>, vector<128x128xf32>
    %1 = arith.truncf %0 : vector<128x128xf32> to vector<128x128xbf16>
    %c0_1 = arith.constant 0 : index
    %c0_2 = arith.constant 0 : index
    %2 = vector.load %arg2[%c0_1, %c0_2] : memref<128x128xbf16, #tpu.memory_space<vmem>>, vector<128x128xbf16>
    %cst = arith.constant dense<0.000000e+00> : vector<128x128xf32>
    %3 = tpu.matmul %1, %2, %cst {dimension_numbers = #tpu.dot_dimension_numbers<[1], [0], [0], [1], [0, 0, 1, 1], [], []>} : vector<128x128xbf16>, vector<128x128xbf16>, vector<128x128xf32> -> vector<128x128xf32>
    %4 = arith.truncf %3 : vector<128x128xf32> to vector<128x128xbf16>
    %c0_3 = arith.constant 0 : index
    %c0_4 = arith.constant 0 : index
    %5 = vector.load %arg3[%c0_3, %c0_4] : memref<128x128xbf16, #tpu.memory_space<vmem>>, vector<128x128xbf16>
    tpu.vector_store %arg3[%c0_3, %c0_4], %4 {strides = array<i32>} : memref<128x128xbf16, #tpu.memory_space<vmem>>, vector<128x128xbf16>,
    %cst_5 = arith.constant dense<0.000000e+00> : vector<128xf32>
    %6 = vector.multi_reduction <add>, %3, %cst_5 [0] : vector<128x128xf32> to vector<128xf32>
    %7 = vector.shape_cast %6 : vector<128xf32> to vector<1x1x128xf32>
    %8 = vector.shape_cast %7 : vector<1x1x128xf32> to vector<1x1x128xf32>
    %9 = vector.broadcast %8 : vector<1x1x128xf32> to vector<1x8x128xf32>
    %c0_6 = arith.constant 0 : index
    %c0_7 = arith.constant 0 : index
    %c0_8 = arith.constant 0 : index
    %10 = vector.load %arg4[%c0_6, %c0_7, %c0_8] : memref<1x8x128xf32, #tpu.memory_space<vmem>>, vector<1x8x128xf32>
    tpu.vector_store %arg4[%c0_6, %c0_7, %c0_8], %9 {strides = array<i32>} : memref<1x8x128xf32, #tpu.memory_space<vmem>>, vector<1x8x128xf32>,
    %11 = arith.mulf %3, %3 : vector<128x128xf32>
    %cst_9 = arith.constant dense<0.000000e+00> : vector<128xf32>
    %12 = vector.multi_reduction <add>, %11, %cst_9 [0] : vector<128x128xf32> to vector<128xf32>
    %13 = vector.shape_cast %12 : vector<128xf32> to vector<1x1x128xf32>
    %14 = vector.shape_cast %13 : vector<1x1x128xf32> to vector<1x1x128xf32>
    %15 = vector.broadcast %14 : vector<1x1x128xf32> to vector<1x8x128xf32>
    %c0_10 = arith.constant 0 : index
    %c0_11 = arith.constant 0 : index
    %c0_12 = arith.constant 0 : index
    %16 = vector.load %arg5[%c0_10, %c0_11, %c0_12] : memref<1x8x128xf32, #tpu.memory_space<vmem>>, vector<1x8x128xf32>
    tpu.vector_store %arg5[%c0_10, %c0_11, %c0_12], %15 {strides = array<i32>} : memref<1x8x128xf32, #tpu.memory_space<vmem>>, vector<1x8x128xf32>,
    return
  }
  func.func @transform_0(%arg0: i32) -> (i32, i32) {
    %c0_i32 = arith.constant 0 : i32
    %c0_i32_0 = arith.constant 0 : i32
    return %arg0, %c0_i32 : i32, i32
  }
  func.func @transform_1(%arg0: i32) -> (i32, i32) {
    %c0_i32 = arith.constant 0 : i32
    %c0_i32_0 = arith.constant 0 : i32
    %c0_i32_1 = arith.constant 0 : i32
    return %c0_i32, %c0_i32_0 : i32, i32
  }
  func.func @transform_2(%arg0: i32) -> (i32, i32) {
    %c0_i32 = arith.constant 0 : i32
    %c0_i32_0 = arith.constant 0 : i32
    return %arg0, %c0_i32 : i32, i32
  }
  func.func @transform_3(%arg0: i32) -> (i32, i32, i32) {
    %c0_i32 = arith.constant 0 : i32
    %c0_i32_0 = arith.constant 0 : i32
    %c0_i32_1 = arith.constant 0 : i32
    return %arg0, %c0_i32, %c0_i32_0 : i32, i32, i32
  }
  func.func @transform_4(%arg0: i32) -> (i32, i32, i32) {
    %c0_i32 = arith.constant 0 : i32
    %c0_i32_0 = arith.constant 0 : i32
    %c0_i32_1 = arith.constant 0 : i32
    return %arg0, %c0_i32, %c0_i32_0 : i32, i32, i32
  }
}

module attributes {stable_mosaic.version = 11 : i64} {
  func.func @kernel(%arg0: i32, %arg1: memref<64x128xbf16, #tpu.memory_space<vmem>>, %arg2: memref<3x384x128xbf16, #tpu.memory_space<vmem>>, %arg3: memref<1x128xf32, #tpu.memory_space<vmem>>, %arg4: memref<1x128xf32, #tpu.memory_space<vmem>>, %arg5: memref<64x128xbf16, #tpu.memory_space<vmem>>, %arg6: memref<1x8x128xf32, #tpu.memory_space<vmem>>, %arg7: memref<1x8x128xf32, #tpu.memory_space<vmem>>, %arg8: memref<80x384xf32, #tpu.memory_space<vmem>>, %arg9: memref<64x128xf32, #tpu.memory_space<vmem>>) attributes {dimension_semantics = [#tpu.dimension_semantics<parallel>], iteration_bounds = array<i64: 2>, scalar_prefetch = 0 : i64, scratch_operands = 2 : i64, tpu.core_type = #tpu.core_type<tc>, window_params = [{transform_indices = @transform_0, window_bounds = array<i64: 64, 128>}, {pipeline_mode = #tpu.pipeline_mode<synchronous>, transform_indices = @transform_1, window_bounds = array<i64: 3, 384, 128>}, {pipeline_mode = #tpu.pipeline_mode<synchronous>, transform_indices = @transform_2, window_bounds = array<i64: 1, 128>}, {pipeline_mode = #tpu.pipeline_mode<synchronous>, transform_indices = @transform_3, window_bounds = array<i64: 1, 128>}, {transform_indices = @transform_4, window_bounds = array<i64: 64, 128>}, {transform_indices = @transform_5, window_bounds = array<i64: 1, 8, 128>}, {transform_indices = @transform_6, window_bounds = array<i64: 1, 8, 128>}]} {
    %c0 = arith.constant 0 : index
    %c0_0 = arith.constant 0 : index
    %0 = vector.load %arg1[%c0, %c0_0] : memref<64x128xbf16, #tpu.memory_space<vmem>>, vector<64x128xbf16>
    %1 = arith.extf %0 : vector<64x128xbf16> to vector<64x128xf32>
    %c0_1 = arith.constant 0 : index
    %c0_2 = arith.constant 0 : index
    %2 = vector.load %arg3[%c0_1, %c0_2] : memref<1x128xf32, #tpu.memory_space<vmem>>, vector<1x128xf32>
    %3 = vector.broadcast %2 : vector<1x128xf32> to vector<64x128xf32>
    %4 = arith.mulf %1, %3 : vector<64x128xf32>
    %c0_3 = arith.constant 0 : index
    %c0_4 = arith.constant 0 : index
    %5 = vector.load %arg4[%c0_3, %c0_4] : memref<1x128xf32, #tpu.memory_space<vmem>>, vector<1x128xf32>
    %6 = vector.broadcast %5 : vector<1x128xf32> to vector<64x128xf32>
    %7 = arith.addf %4, %6 : vector<64x128xf32>
    %cst = arith.constant 0.000000e+00 : f32
    %8 = vector.broadcast %cst : f32 to vector<64x128xf32>
    %9 = arith.maximumf %7, %8 : vector<64x128xf32>
    %cst_5 = arith.constant 0.000000e+00 : f32
    %10 = vector.broadcast %cst_5 : f32 to vector<8x384xf32>
    %c0_6 = arith.constant 0 : index
    %c0_7 = arith.constant 0 : index
    %11 = vector.load %arg8[%c0_6, %c0_7] : memref<80x384xf32, #tpu.memory_space<vmem>>, vector<8x384xf32>
    tpu.vector_store %arg8[%c0_6, %c0_7], %10 {strides = array<i32>} : memref<80x384xf32, #tpu.memory_space<vmem>>, vector<8x384xf32>,
    %cst_8 = arith.constant 0.000000e+00 : f32
    %12 = vector.broadcast %cst_8 : f32 to vector<8x384xf32>
    %c72 = arith.constant 72 : index
    %c0_9 = arith.constant 0 : index
    %13 = vector.load %arg8[%c72, %c0_9] : memref<80x384xf32, #tpu.memory_space<vmem>>, vector<8x384xf32>
    tpu.vector_store %arg8[%c72, %c0_9], %12 {strides = array<i32>} : memref<80x384xf32, #tpu.memory_space<vmem>>, vector<8x384xf32>,
    %c8 = arith.constant 8 : index
    %c128 = arith.constant 128 : index
    %14 = vector.load %arg8[%c8, %c128] : memref<80x384xf32, #tpu.memory_space<vmem>>, vector<64x128xf32>
    tpu.vector_store %arg8[%c8, %c128], %9 {strides = array<i32>} : memref<80x384xf32, #tpu.memory_space<vmem>>, vector<64x128xf32>,
    %15 = tpu.iota {dimensions = array<i32: 0>} : vector<64x1xi32>
    %c8_i32 = arith.constant 8 : i32
    %c0_i32 = arith.constant 0 : i32
    %16 = arith.cmpi eq, %c8_i32, %c0_i32 : i32
    %c1_i32 = arith.constant 1 : i32
    %17 = arith.select %16, %c1_i32, %c8_i32 : i32
    %18 = vector.broadcast %17 : i32 to vector<64x1xi32>
    %19 = arith.remsi %15, %18 : vector<64x1xi32>
    %c0_i32_10 = arith.constant 0 : i32
    %20 = vector.broadcast %c0_i32_10 : i32 to vector<64x1xi32>
    %21 = arith.cmpi ne, %19, %20 : vector<64x1xi32>
    %c0_i32_11 = arith.constant 0 : i32
    %22 = vector.broadcast %c0_i32_11 : i32 to vector<64x1xi32>
    %23 = arith.cmpi slt, %19, %22 : vector<64x1xi32>
    %c0_i32_12 = arith.constant 0 : i32
    %24 = arith.cmpi slt, %17, %c0_i32_12 : i32
    %25 = vector.broadcast %24 : i1 to vector<64x1xi1>
    %26 = vector.broadcast %25 : vector<64x1xi1> to vector<64x1xi1>
    %27 = arith.xori %23, %26 : vector<64x1xi1>
    %28 = arith.andi %27, %21 : vector<64x1xi1>
    %29 = vector.broadcast %17 : i32 to vector<64x1xi32>
    %30 = arith.addi %19, %29 : vector<64x1xi32>
    %31 = arith.select %28, %30, %19 : vector<64x1xi1>, vector<64x1xi32>
    %c0_i32_13 = arith.constant 0 : i32
    %32 = vector.broadcast %c0_i32_13 : i32 to vector<64x1xi32>
    %33 = arith.cmpi eq, %31, %32 : vector<64x1xi32>
    %c7 = arith.constant 7 : index
    %c128_14 = arith.constant 128 : index
    %34 = vector.load %arg8[%c7, %c128_14] : memref<80x384xf32, #tpu.memory_space<vmem>>, vector<64x128xf32>
    %cst_15 = arith.constant 0.000000e+00 : f32
    %35 = vector.shape_cast %33 : vector<64x1xi1> to vector<64x1xi1>
    %36 = vector.broadcast %35 : vector<64x1xi1> to vector<64x128xi1>
    %37 = vector.broadcast %cst_15 : f32 to vector<64x128xf32>
    %38 = arith.select %36, %37, %34 : vector<64x128xi1>, vector<64x128xf32>
    %c7_i32 = arith.constant 7 : i32
    %39 = vector.broadcast %c7_i32 : i32 to vector<64x1xi32>
    %40 = arith.cmpi eq, %31, %39 : vector<64x1xi32>
    %c9 = arith.constant 9 : index
    %c128_16 = arith.constant 128 : index
    %41 = vector.load %arg8[%c9, %c128_16] : memref<80x384xf32, #tpu.memory_space<vmem>>, vector<64x128xf32>
    %cst_17 = arith.constant 0.000000e+00 : f32
    %42 = vector.shape_cast %40 : vector<64x1xi1> to vector<64x1xi1>
    %43 = vector.broadcast %42 : vector<64x1xi1> to vector<64x128xi1>
    %44 = vector.broadcast %cst_17 : f32 to vector<64x128xf32>
    %45 = arith.select %43, %44, %41 : vector<64x128xi1>, vector<64x128xf32>
    %c8_18 = arith.constant 8 : index
    %c0_19 = arith.constant 0 : index
    %46 = vector.load %arg8[%c8_18, %c0_19] : memref<80x384xf32, #tpu.memory_space<vmem>>, vector<64x128xf32>
    tpu.vector_store %arg8[%c8_18, %c0_19], %38 {strides = array<i32>} : memref<80x384xf32, #tpu.memory_space<vmem>>, vector<64x128xf32>,
    %c8_20 = arith.constant 8 : index
    %c256 = arith.constant 256 : index
    %47 = vector.load %arg8[%c8_20, %c256] : memref<80x384xf32, #tpu.memory_space<vmem>>, vector<64x128xf32>
    tpu.vector_store %arg8[%c8_20, %c256], %45 {strides = array<i32>} : memref<80x384xf32, #tpu.memory_space<vmem>>, vector<64x128xf32>,
    %c0_21 = arith.constant 0 : index
    %c0_22 = arith.constant 0 : index
    %48 = vector.load %arg8[%c0_21, %c0_22] : memref<80x384xf32, #tpu.memory_space<vmem>>, vector<64x384xf32>
    %49 = arith.truncf %48 : vector<64x384xf32> to vector<64x384xbf16>
    %c0_23 = arith.constant 0 : index
    %c0_24 = arith.constant 0 : index
    %c0_25 = arith.constant 0 : index
    %50 = vector.load %arg2[%c0_23, %c0_24, %c0_25] : memref<3x384x128xbf16, #tpu.memory_space<vmem>>, vector<1x384x128xbf16>
    %51 = vector.shape_cast %50 : vector<1x384x128xbf16> to vector<384x128xbf16>
    %cst_26 = arith.constant dense<0.000000e+00> : vector<64x128xf32>
    %52 = tpu.matmul %49, %51, %cst_26 {dimension_numbers = #tpu.dot_dimension_numbers<[1], [0], [0], [1], [0, 0, 1, 1], [], []>} : vector<64x384xbf16>, vector<384x128xbf16>, vector<64x128xf32> -> vector<64x128xf32>
    %c0_27 = arith.constant 0 : index
    %c0_28 = arith.constant 0 : index
    %53 = vector.load %arg9[%c0_27, %c0_28] : memref<64x128xf32, #tpu.memory_space<vmem>>, vector<64x128xf32>
    tpu.vector_store %arg9[%c0_27, %c0_28], %52 {strides = array<i32>} : memref<64x128xf32, #tpu.memory_space<vmem>>, vector<64x128xf32>,
    %c8_29 = arith.constant 8 : index
    %c0_30 = arith.constant 0 : index
    %54 = vector.load %arg8[%c8_29, %c0_30] : memref<80x384xf32, #tpu.memory_space<vmem>>, vector<64x384xf32>
    %55 = arith.truncf %54 : vector<64x384xf32> to vector<64x384xbf16>
    %c1 = arith.constant 1 : index
    %c0_31 = arith.constant 0 : index
    %c0_32 = arith.constant 0 : index
    %56 = vector.load %arg2[%c1, %c0_31, %c0_32] : memref<3x384x128xbf16, #tpu.memory_space<vmem>>, vector<1x384x128xbf16>
    %57 = vector.shape_cast %56 : vector<1x384x128xbf16> to vector<384x128xbf16>
    %cst_33 = arith.constant dense<0.000000e+00> : vector<64x128xf32>
    %58 = tpu.matmul %55, %57, %cst_33 {dimension_numbers = #tpu.dot_dimension_numbers<[1], [0], [0], [1], [0, 0, 1, 1], [], []>} : vector<64x384xbf16>, vector<384x128xbf16>, vector<64x128xf32> -> vector<64x128xf32>
    %c0_34 = arith.constant 0 : index
    %c0_35 = arith.constant 0 : index
    %59 = vector.load %arg9[%c0_34, %c0_35] : memref<64x128xf32, #tpu.memory_space<vmem>>, vector<64x128xf32>
    %60 = arith.addf %59, %58 : vector<64x128xf32>
    %c0_36 = arith.constant 0 : index
    %c0_37 = arith.constant 0 : index
    %61 = vector.load %arg9[%c0_36, %c0_37] : memref<64x128xf32, #tpu.memory_space<vmem>>, vector<64x128xf32>
    tpu.vector_store %arg9[%c0_36, %c0_37], %60 {strides = array<i32>} : memref<64x128xf32, #tpu.memory_space<vmem>>, vector<64x128xf32>,
    %c16 = arith.constant 16 : index
    %c0_38 = arith.constant 0 : index
    %62 = vector.load %arg8[%c16, %c0_38] : memref<80x384xf32, #tpu.memory_space<vmem>>, vector<64x384xf32>
    %63 = arith.truncf %62 : vector<64x384xf32> to vector<64x384xbf16>
    %c2 = arith.constant 2 : index
    %c0_39 = arith.constant 0 : index
    %c0_40 = arith.constant 0 : index
    %64 = vector.load %arg2[%c2, %c0_39, %c0_40] : memref<3x384x128xbf16, #tpu.memory_space<vmem>>, vector<1x384x128xbf16>
    %65 = vector.shape_cast %64 : vector<1x384x128xbf16> to vector<384x128xbf16>
    %cst_41 = arith.constant dense<0.000000e+00> : vector<64x128xf32>
    %66 = tpu.matmul %63, %65, %cst_41 {dimension_numbers = #tpu.dot_dimension_numbers<[1], [0], [0], [1], [0, 0, 1, 1], [], []>} : vector<64x384xbf16>, vector<384x128xbf16>, vector<64x128xf32> -> vector<64x128xf32>
    %c0_42 = arith.constant 0 : index
    %c0_43 = arith.constant 0 : index
    %67 = vector.load %arg9[%c0_42, %c0_43] : memref<64x128xf32, #tpu.memory_space<vmem>>, vector<64x128xf32>
    %68 = arith.addf %67, %66 : vector<64x128xf32>
    %c0_44 = arith.constant 0 : index
    %c0_45 = arith.constant 0 : index
    %69 = vector.load %arg9[%c0_44, %c0_45] : memref<64x128xf32, #tpu.memory_space<vmem>>, vector<64x128xf32>
    tpu.vector_store %arg9[%c0_44, %c0_45], %68 {strides = array<i32>} : memref<64x128xf32, #tpu.memory_space<vmem>>, vector<64x128xf32>,
    %c0_46 = arith.constant 0 : index
    %c0_47 = arith.constant 0 : index
    %70 = vector.load %arg9[%c0_46, %c0_47] : memref<64x128xf32, #tpu.memory_space<vmem>>, vector<64x128xf32>
    %71 = arith.truncf %70 : vector<64x128xf32> to vector<64x128xbf16>
    %c0_48 = arith.constant 0 : index
    %c0_49 = arith.constant 0 : index
    %72 = vector.load %arg5[%c0_48, %c0_49] : memref<64x128xbf16, #tpu.memory_space<vmem>>, vector<64x128xbf16>
    tpu.vector_store %arg5[%c0_48, %c0_49], %71 {strides = array<i32>} : memref<64x128xbf16, #tpu.memory_space<vmem>>, vector<64x128xbf16>,
    %cst_50 = arith.constant dense<0.000000e+00> : vector<128xf32>
    %73 = vector.multi_reduction <add>, %70, %cst_50 [0] : vector<64x128xf32> to vector<128xf32>
    %74 = vector.shape_cast %73 : vector<128xf32> to vector<1x1x128xf32>
    %75 = vector.shape_cast %74 : vector<1x1x128xf32> to vector<1x1x128xf32>
    %76 = vector.broadcast %75 : vector<1x1x128xf32> to vector<1x8x128xf32>
    %c0_51 = arith.constant 0 : index
    %c0_52 = arith.constant 0 : index
    %c0_53 = arith.constant 0 : index
    %77 = vector.load %arg6[%c0_51, %c0_52, %c0_53] : memref<1x8x128xf32, #tpu.memory_space<vmem>>, vector<1x8x128xf32>
    tpu.vector_store %arg6[%c0_51, %c0_52, %c0_53], %76 {strides = array<i32>} : memref<1x8x128xf32, #tpu.memory_space<vmem>>, vector<1x8x128xf32>,
    %78 = arith.mulf %70, %70 : vector<64x128xf32>
    %cst_54 = arith.constant dense<0.000000e+00> : vector<128xf32>
    %79 = vector.multi_reduction <add>, %78, %cst_54 [0] : vector<64x128xf32> to vector<128xf32>
    %80 = vector.shape_cast %79 : vector<128xf32> to vector<1x1x128xf32>
    %81 = vector.shape_cast %80 : vector<1x1x128xf32> to vector<1x1x128xf32>
    %82 = vector.broadcast %81 : vector<1x1x128xf32> to vector<1x8x128xf32>
    %c0_55 = arith.constant 0 : index
    %c0_56 = arith.constant 0 : index
    %c0_57 = arith.constant 0 : index
    %83 = vector.load %arg7[%c0_55, %c0_56, %c0_57] : memref<1x8x128xf32, #tpu.memory_space<vmem>>, vector<1x8x128xf32>
    tpu.vector_store %arg7[%c0_55, %c0_56, %c0_57], %82 {strides = array<i32>} : memref<1x8x128xf32, #tpu.memory_space<vmem>>, vector<1x8x128xf32>,
    return
  }
  func.func @transform_0(%arg0: i32) -> (i32, i32) {
    %c0_i32 = arith.constant 0 : i32
    %c0_i32_0 = arith.constant 0 : i32
    return %arg0, %c0_i32 : i32, i32
  }
  func.func @transform_1(%arg0: i32) -> (i32, i32, i32) {
    %c0_i32 = arith.constant 0 : i32
    %c0_i32_0 = arith.constant 0 : i32
    %c0_i32_1 = arith.constant 0 : i32
    %c0_i32_2 = arith.constant 0 : i32
    return %c0_i32, %c0_i32_0, %c0_i32_1 : i32, i32, i32
  }
  func.func @transform_2(%arg0: i32) -> (i32, i32) {
    %c0_i32 = arith.constant 0 : i32
    %c0_i32_0 = arith.constant 0 : i32
    %c0_i32_1 = arith.constant 0 : i32
    return %c0_i32, %c0_i32_0 : i32, i32
  }
  func.func @transform_3(%arg0: i32) -> (i32, i32) {
    %c0_i32 = arith.constant 0 : i32
    %c0_i32_0 = arith.constant 0 : i32
    %c0_i32_1 = arith.constant 0 : i32
    return %c0_i32, %c0_i32_0 : i32, i32
  }
  func.func @transform_4(%arg0: i32) -> (i32, i32) {
    %c0_i32 = arith.constant 0 : i32
    %c0_i32_0 = arith.constant 0 : i32
    return %arg0, %c0_i32 : i32, i32
  }
  func.func @transform_5(%arg0: i32) -> (i32, i32, i32) {
    %c0_i32 = arith.constant 0 : i32
    %c0_i32_0 = arith.constant 0 : i32
    %c0_i32_1 = arith.constant 0 : i32
    return %arg0, %c0_i32, %c0_i32_0 : i32, i32, i32
  }
  func.func @transform_6(%arg0: i32) -> (i32, i32, i32) {
    %c0_i32 = arith.constant 0 : i32
    %c0_i32_0 = arith.constant 0 : i32
    %c0_i32_1 = arith.constant 0 : i32
    return %arg0, %c0_i32, %c0_i32_0 : i32, i32, i32
  }
}

module attributes {stable_mosaic.version = 11 : i64} {
  func.func @_bn_add_relu_kernel(%arg0: i32, %arg1: memref<128x128xbf16, #tpu.memory_space<vmem>>, %arg2: memref<1x128xf32, #tpu.memory_space<vmem>>, %arg3: memref<1x128xf32, #tpu.memory_space<vmem>>, %arg4: memref<128x128xf32, #tpu.memory_space<vmem>>, %arg5: memref<128x128xf32, #tpu.memory_space<vmem>>) attributes {dimension_semantics = [#tpu.dimension_semantics<parallel>], iteration_bounds = array<i64: 1>, scalar_prefetch = 0 : i64, scratch_operands = 0 : i64, tpu.core_type = #tpu.core_type<tc>, window_params = [{transform_indices = @transform_0, window_bounds = array<i64: 128, 128>}, {pipeline_mode = #tpu.pipeline_mode<synchronous>, transform_indices = @transform_1, window_bounds = array<i64: 1, 128>}, {pipeline_mode = #tpu.pipeline_mode<synchronous>, transform_indices = @transform_2, window_bounds = array<i64: 1, 128>}, {transform_indices = @transform_3, window_bounds = array<i64: 128, 128>}, {transform_indices = @transform_4, window_bounds = array<i64: 128, 128>}]} {
    %c0 = arith.constant 0 : index
    %c0_0 = arith.constant 0 : index
    %0 = vector.load %arg1[%c0, %c0_0] : memref<128x128xbf16, #tpu.memory_space<vmem>>, vector<128x128xbf16>
    %1 = arith.extf %0 : vector<128x128xbf16> to vector<128x128xf32>
    %c0_1 = arith.constant 0 : index
    %c0_2 = arith.constant 0 : index
    %2 = vector.load %arg2[%c0_1, %c0_2] : memref<1x128xf32, #tpu.memory_space<vmem>>, vector<1x128xf32>
    %3 = vector.broadcast %2 : vector<1x128xf32> to vector<128x128xf32>
    %4 = arith.mulf %1, %3 : vector<128x128xf32>
    %c0_3 = arith.constant 0 : index
    %c0_4 = arith.constant 0 : index
    %5 = vector.load %arg3[%c0_3, %c0_4] : memref<1x128xf32, #tpu.memory_space<vmem>>, vector<1x128xf32>
    %6 = vector.broadcast %5 : vector<1x128xf32> to vector<128x128xf32>
    %7 = arith.addf %4, %6 : vector<128x128xf32>
    %c0_5 = arith.constant 0 : index
    %c0_6 = arith.constant 0 : index
    %8 = vector.load %arg4[%c0_5, %c0_6] : memref<128x128xf32, #tpu.memory_space<vmem>>, vector<128x128xf32>
    %9 = arith.addf %7, %8 : vector<128x128xf32>
    %cst = arith.constant 0.000000e+00 : f32
    %10 = vector.broadcast %cst : f32 to vector<128x128xf32>
    %11 = arith.maximumf %9, %10 : vector<128x128xf32>
    %c0_7 = arith.constant 0 : index
    %c0_8 = arith.constant 0 : index
    %12 = vector.load %arg5[%c0_7, %c0_8] : memref<128x128xf32, #tpu.memory_space<vmem>>, vector<128x128xf32>
    tpu.vector_store %arg5[%c0_7, %c0_8], %11 {strides = array<i32>} : memref<128x128xf32, #tpu.memory_space<vmem>>, vector<128x128xf32>,
    return
  }
  func.func @transform_0(%arg0: i32) -> (i32, i32) {
    %c0_i32 = arith.constant 0 : i32
    %c0_i32_0 = arith.constant 0 : i32
    return %arg0, %c0_i32 : i32, i32
  }
  func.func @transform_1(%arg0: i32) -> (i32, i32) {
    %c0_i32 = arith.constant 0 : i32
    %c0_i32_0 = arith.constant 0 : i32
    %c0_i32_1 = arith.constant 0 : i32
    return %c0_i32, %c0_i32_0 : i32, i32
  }
  func.func @transform_2(%arg0: i32) -> (i32, i32) {
    %c0_i32 = arith.constant 0 : i32
    %c0_i32_0 = arith.constant 0 : i32
    %c0_i32_1 = arith.constant 0 : i32
    return %c0_i32, %c0_i32_0 : i32, i32
  }
  func.func @transform_3(%arg0: i32) -> (i32, i32) {
    %c0_i32 = arith.constant 0 : i32
    %c0_i32_0 = arith.constant 0 : i32
    return %arg0, %c0_i32 : i32, i32
  }
  func.func @transform_4(%arg0: i32) -> (i32, i32) {
    %c0_i32 = arith.constant 0 : i32
    %c0_i32_0 = arith.constant 0 : i32
    return %arg0, %c0_i32 : i32, i32
  }
}

module attributes {stable_mosaic.version = 11 : i64} {
  func.func @kernel(%arg0: i32, %arg1: memref<128x128xbf16, #tpu.memory_space<vmem>>, %arg2: memref<128x128xbf16, #tpu.memory_space<vmem>>, %arg3: memref<1x128xf32, #tpu.memory_space<vmem>>, %arg4: memref<1x128xf32, #tpu.memory_space<vmem>>, %arg5: memref<128x128xbf16, #tpu.memory_space<vmem>>, %arg6: memref<1x8x128xf32, #tpu.memory_space<vmem>>, %arg7: memref<1x8x128xf32, #tpu.memory_space<vmem>>) attributes {dimension_semantics = [#tpu.dimension_semantics<parallel>], iteration_bounds = array<i64: 1>, scalar_prefetch = 0 : i64, scratch_operands = 0 : i64, tpu.core_type = #tpu.core_type<tc>, window_params = [{transform_indices = @transform_0, window_bounds = array<i64: 128, 128>}, {pipeline_mode = #tpu.pipeline_mode<synchronous>, transform_indices = @transform_1, window_bounds = array<i64: 128, 128>}, {pipeline_mode = #tpu.pipeline_mode<synchronous>, transform_indices = @transform_2, window_bounds = array<i64: 1, 128>}, {pipeline_mode = #tpu.pipeline_mode<synchronous>, transform_indices = @transform_3, window_bounds = array<i64: 1, 128>}, {transform_indices = @transform_4, window_bounds = array<i64: 128, 128>}, {transform_indices = @transform_5, window_bounds = array<i64: 1, 8, 128>}, {transform_indices = @transform_6, window_bounds = array<i64: 1, 8, 128>}]} {
    %c0 = arith.constant 0 : index
    %c0_0 = arith.constant 0 : index
    %0 = vector.load %arg1[%c0, %c0_0] : memref<128x128xbf16, #tpu.memory_space<vmem>>, vector<128x128xbf16>
    %1 = arith.extf %0 : vector<128x128xbf16> to vector<128x128xf32>
    %c0_1 = arith.constant 0 : index
    %c0_2 = arith.constant 0 : index
    %2 = vector.load %arg3[%c0_1, %c0_2] : memref<1x128xf32, #tpu.memory_space<vmem>>, vector<1x128xf32>
    %3 = vector.broadcast %2 : vector<1x128xf32> to vector<128x128xf32>
    %4 = arith.mulf %1, %3 : vector<128x128xf32>
    %c0_3 = arith.constant 0 : index
    %c0_4 = arith.constant 0 : index
    %5 = vector.load %arg4[%c0_3, %c0_4] : memref<1x128xf32, #tpu.memory_space<vmem>>, vector<1x128xf32>
    %6 = vector.broadcast %5 : vector<1x128xf32> to vector<128x128xf32>
    %7 = arith.addf %4, %6 : vector<128x128xf32>
    %cst = arith.constant 0.000000e+00 : f32
    %8 = vector.broadcast %cst : f32 to vector<128x128xf32>
    %9 = arith.maximumf %7, %8 : vector<128x128xf32>
    %10 = arith.truncf %9 : vector<128x128xf32> to vector<128x128xbf16>
    %c0_5 = arith.constant 0 : index
    %c0_6 = arith.constant 0 : index
    %11 = vector.load %arg2[%c0_5, %c0_6] : memref<128x128xbf16, #tpu.memory_space<vmem>>, vector<128x128xbf16>
    %cst_7 = arith.constant dense<0.000000e+00> : vector<128x128xf32>
    %12 = tpu.matmul %10, %11, %cst_7 {dimension_numbers = #tpu.dot_dimension_numbers<[1], [0], [0], [1], [0, 0, 1, 1], [], []>} : vector<128x128xbf16>, vector<128x128xbf16>, vector<128x128xf32> -> vector<128x128xf32>
    %13 = arith.truncf %12 : vector<128x128xf32> to vector<128x128xbf16>
    %c0_8 = arith.constant 0 : index
    %c0_9 = arith.constant 0 : index
    %14 = vector.load %arg5[%c0_8, %c0_9] : memref<128x128xbf16, #tpu.memory_space<vmem>>, vector<128x128xbf16>
    tpu.vector_store %arg5[%c0_8, %c0_9], %13 {strides = array<i32>} : memref<128x128xbf16, #tpu.memory_space<vmem>>, vector<128x128xbf16>,
    %cst_10 = arith.constant dense<0.000000e+00> : vector<128xf32>
    %15 = vector.multi_reduction <add>, %12, %cst_10 [0] : vector<128x128xf32> to vector<128xf32>
    %16 = vector.shape_cast %15 : vector<128xf32> to vector<1x1x128xf32>
    %17 = vector.shape_cast %16 : vector<1x1x128xf32> to vector<1x1x128xf32>
    %18 = vector.broadcast %17 : vector<1x1x128xf32> to vector<1x8x128xf32>
    %c0_11 = arith.constant 0 : index
    %c0_12 = arith.constant 0 : index
    %c0_13 = arith.constant 0 : index
    %19 = vector.load %arg6[%c0_11, %c0_12, %c0_13] : memref<1x8x128xf32, #tpu.memory_space<vmem>>, vector<1x8x128xf32>
    tpu.vector_store %arg6[%c0_11, %c0_12, %c0_13], %18 {strides = array<i32>} : memref<1x8x128xf32, #tpu.memory_space<vmem>>, vector<1x8x128xf32>,
    %20 = arith.mulf %12, %12 : vector<128x128xf32>
    %cst_14 = arith.constant dense<0.000000e+00> : vector<128xf32>
    %21 = vector.multi_reduction <add>, %20, %cst_14 [0] : vector<128x128xf32> to vector<128xf32>
    %22 = vector.shape_cast %21 : vector<128xf32> to vector<1x1x128xf32>
    %23 = vector.shape_cast %22 : vector<1x1x128xf32> to vector<1x1x128xf32>
    %24 = vector.broadcast %23 : vector<1x1x128xf32> to vector<1x8x128xf32>
    %c0_15 = arith.constant 0 : index
    %c0_16 = arith.constant 0 : index
    %c0_17 = arith.constant 0 : index
    %25 = vector.load %arg7[%c0_15, %c0_16, %c0_17] : memref<1x8x128xf32, #tpu.memory_space<vmem>>, vector<1x8x128xf32>
    tpu.vector_store %arg7[%c0_15, %c0_16, %c0_17], %24 {strides = array<i32>} : memref<1x8x128xf32, #tpu.memory_space<vmem>>, vector<1x8x128xf32>,
    return
  }
  func.func @transform_0(%arg0: i32) -> (i32, i32) {
    %c0_i32 = arith.constant 0 : i32
    %c0_i32_0 = arith.constant 0 : i32
    return %arg0, %c0_i32 : i32, i32
  }
  func.func @transform_1(%arg0: i32) -> (i32, i32) {
    %c0_i32 = arith.constant 0 : i32
    %c0_i32_0 = arith.constant 0 : i32
    %c0_i32_1 = arith.constant 0 : i32
    return %c0_i32, %c0_i32_0 : i32, i32
  }
  func.func @transform_2(%arg0: i32) -> (i32, i32) {
    %c0_i32 = arith.constant 0 : i32
    %c0_i32_0 = arith.constant 0 : i32
    %c0_i32_1 = arith.constant 0 : i32
    return %c0_i32, %c0_i32_0 : i32, i32
  }
  func.func @transform_3(%arg0: i32) -> (i32, i32) {
    %c0_i32 = arith.constant 0 : i32
    %c0_i32_0 = arith.constant 0 : i32
    %c0_i32_1 = arith.constant 0 : i32
    return %c0_i32, %c0_i32_0 : i32, i32
  }
  func.func @transform_4(%arg0: i32) -> (i32, i32) {
    %c0_i32 = arith.constant 0 : i32
    %c0_i32_0 = arith.constant 0 : i32
    return %arg0, %c0_i32 : i32, i32
  }
  func.func @transform_5(%arg0: i32) -> (i32, i32, i32) {
    %c0_i32 = arith.constant 0 : i32
    %c0_i32_0 = arith.constant 0 : i32
    %c0_i32_1 = arith.constant 0 : i32
    return %arg0, %c0_i32, %c0_i32_0 : i32, i32, i32
  }
  func.func @transform_6(%arg0: i32) -> (i32, i32, i32) {
    %c0_i32 = arith.constant 0 : i32
    %c0_i32_0 = arith.constant 0 : i32
    %c0_i32_1 = arith.constant 0 : i32
    return %arg0, %c0_i32, %c0_i32_0 : i32, i32, i32
  }
}

</mosaic_0001>

<bundles_post_ra>
// kernel: bottleneck_forward.4
= control target key start
LH: loop header
LB: loop body
LE: loop exit
PB: predicated region body
PF: predicated region fallthrough
CT: control target
= control target key end

     0   :  { %s499_s1 = inlined_call_operand.vmem [shape: bf16[128,128], index: 1, kind: input, shape index: {}]   ;;  %s500_s0 = inlined_call_operand.vmem [shape: f32[128,128], index: 0, kind: input, shape index: {}]   ;;  %s501_s2 = inlined_call_operand.vmem [shape: bf16[128,128], index: 2, kind: output, shape index: {0}]   ;;  %s502_s3 = inlined_call_operand.vmem [shape: f32[1,8,128], index: 3, kind: output, shape index: {1}]   ;;  %s503_s4 = inlined_call_operand.vmem [shape: f32[1,8,128], index: 4, kind: output, shape index: {2}]  }
   0x1   :  { %v294_v0 = vld [vmem:[%s499_s1 + $0x38] sm:$0xff]  ;;  %v293_v1 = vld [vmem:[%s499_s1 + $0x30] sm:$0xff]  ;;  %v292_v2 = vld [vmem:[%s499_s1 + $0x28] sm:$0xff] }
   0x2   :  { %102 = vmatpush.bf16.msra.mxu0 %v294_v0  ;;  %342 = vmatpush.bf16.msra.mxu1 %v294_v0  ;;  %v291_v3 = vld [vmem:[%s499_s1 + $0x20] sm:$0xff]  ;;  %v290_v4 = vld [vmem:[%s499_s1 + $0x18] sm:$0xff]  ;;  %v289_v5 = vld [vmem:[%s499_s1 + $0x10] sm:$0xff] }
   0x3   :  { %343 = vmatpush.bf16.msra.mxu2 %v294_v0  ;;  %344 = vmatpush.bf16.msra.mxu3 %v294_v0  ;;  %v288_v6 = vld [vmem:[%s499_s1 + $0x8] sm:$0xff]  ;;  %v287_v7 = vld [vmem:[%s499_s1] sm:$0xff]  ;;  %v16_v20 = vld [vmem:[%s500_s0 + $0x10] sm:$0xff] }
   0x4   :  { %v14_v8 = vld [vmem:[%s500_s0] sm:$0xff]  ;;  %v15_v9 = vld [vmem:[%s500_s0 + $0x8] sm:$0xff]  ;;  %v17_v21 = vld [vmem:[%s500_s0 + $0x18] sm:$0xff] }
   0x5   :  { %v18_v10 = vld [vmem:[%s500_s0 + $0x20] sm:$0xff]  ;;  %v19_v11 = vld [vmem:[%s500_s0 + $0x28] sm:$0xff]  ;;  %v30_v16 = vpack.c.bf16 %v15_v9, %v14_v8  ;;  %v20_v22 = vld [vmem:[%s500_s0 + $0x30] sm:$0xff]  ;;  %v31_v28 = vpack.c.bf16 %v17_v21, %v16_v20 }
   0x6   :  { %103 = vmatpush.bf16.msra.mxu0 %v293_v1  ;;  %345 = vmatpush.bf16.msra.mxu1 %v293_v1  ;;  %v22_v12 = vld [vmem:[%s500_s0 + $0x40] sm:$0xff]  ;;  %v23_v13 = vld [vmem:[%s500_s0 + $0x48] sm:$0xff]  ;;  %v32_v17 = vpack.c.bf16 %v19_v11, %v18_v10  ;;  %v21_v23 = vld [vmem:[%s500_s0 + $0x38] sm:$0xff] }
   0x7   :  { %346 = vmatpush.bf16.msra.mxu2 %v293_v1  ;;  %347 = vmatpush.bf16.msra.mxu3 %v293_v1  ;;  %v26_v14 = vld [vmem:[%s500_s0 + $0x60] sm:$0xff]  ;;  %v27_v15 = vld [vmem:[%s500_s0 + $0x68] sm:$0xff]  ;;  %v34_v18 = vpack.c.bf16 %v23_v13, %v22_v12  ;;  %v24_v24 = vld [vmem:[%s500_s0 + $0x50] sm:$0xff]  ;;  %v33_v29 = vpack.c.bf16 %v21_v23, %v20_v22 }
   0x8   :  { %v36_v19 = vpack.c.bf16 %v27_v15, %v26_v14  ;;  %v25_v25 = vld [vmem:[%s500_s0 + $0x58] sm:$0xff]  ;;  %v28_v26 = vld [vmem:[%s500_s0 + $0x70] sm:$0xff] }
   0x9   :  { %v29_v27 = vld [vmem:[%s500_s0 + $0x78] sm:$0xff]  ;;  %v35_v30 = vpack.c.bf16 %v25_v25, %v24_v24 }
   0xa   :  { %104 = vmatpush.bf16.msra.mxu0 %v292_v2  ;;  %348 = vmatpush.bf16.msra.mxu1 %v292_v2  ;;  %v37_v31 = vpack.c.bf16 %v29_v27, %v28_v26 }
   0xb   :  { %349 = vmatpush.bf16.msra.mxu2 %v292_v2  ;;  %350 = vmatpush.bf16.msra.mxu3 %v292_v2 }
   0xe   :  { %105 = vmatpush.bf16.msra.mxu0 %v291_v3  ;;  %351 = vmatpush.bf16.msra.mxu1 %v291_v3 }
   0xf   :  { %352 = vmatpush.bf16.msra.mxu2 %v291_v3  ;;  %353 = vmatpush.bf16.msra.mxu3 %v291_v3 }
  0x12   :  { %106 = vmatpush.bf16.msra.mxu0 %v290_v4  ;;  %354 = vmatpush.bf16.msra.mxu1 %v290_v4 }
  0x13   :  { %355 = vmatpush.bf16.msra.mxu2 %v290_v4  ;;  %356 = vmatpush.bf16.msra.mxu3 %v290_v4 }
  0x16   :  { %107 = vmatpush.bf16.msra.mxu0 %v289_v5  ;;  %357 = vmatpush.bf16.msra.mxu1 %v289_v5 }
  0x17   :  { %358 = vmatpush.bf16.msra.mxu2 %v289_v5  ;;  %359 = vmatpush.bf16.msra.mxu3 %v289_v5 }
  0x1a   :  { %108 = vmatpush.bf16.msra.mxu0 %v288_v6  ;;  %360 = vmatpush.bf16.msra.mxu1 %v288_v6 }
  0x1b   :  { %361 = vmatpush.bf16.msra.mxu2 %v288_v6  ;;  %362 = vmatpush.bf16.msra.mxu3 %v288_v6 }
  0x1e   :  { %109 = vmatpush.bf16.msra.mxu0 %v287_v7  ;;  %363 = vmatpush.bf16.msra.mxu1 %v287_v7 }
  0x1f   :  { %364 = vmatpush.bf16.msra.mxu2 %v287_v7  ;;  %365 = vmatpush.bf16.msra.mxu3 %v287_v7 }
  0x21   :  { %110 = vmatmul.bf16.vlgmr.msra.gmra.mxu0 %v30_v16  ;;  %120 = vmatmul.bf16.vlgmr.msra.gmra.mxu1 %v32_v17 }
  0x22   :  { %130 = vmatmul.bf16.vlgmr.msra.gmra.mxu2 %v34_v18  ;;  %140 = vmatmul.bf16.vlgmr.msra.gmra.mxu3 %v36_v19 }
  0x31   :  { %115 = vmatmul.bf16.gmra.mxu0 %v31_v28  ;;  %125 = vmatmul.bf16.gmra.mxu1 %v33_v29 }
  0x32   :  { %135 = vmatmul.bf16.gmra.mxu2 %v35_v30  ;;  %145 = vmatmul.bf16.gmra.mxu3 %v37_v31 }
  0x9e   :  { %v111_v32 = vpop.f32.mrf.mxu0  ;;  %v121_v33 = vpop.f32.mrf.mxu1 }
  0x9f   :  { %v205_v47 = vmul.f32 %v111_v32, %v111_v32  ;;  %v209_v61 = vmul.f32 %v121_v33, %v121_v33 }
  0xa5   :  { %v131_v34 = vpop.f32.mrf.mxu2  ;;  %v463_v35 = vpop.f32.mrf.mxu3 }
  0xa6   :  { %v113_v36 = vpop.f32.mrf.mxu0  ;;  %v123_v37 = vpop.f32.mrf.mxu1  ;;  %v213_v13 = vmul.f32 %v131_v34, %v131_v34  ;;  %v217_v25 = vmul.f32 %v463_v35, %v463_v35 }
  0xa7   :  { %v298_v38 = vpack.c.bf16 %v113_v36, %v111_v32  ;;  %v308_v39 = vpack.c.bf16 %v123_v37, %v121_v33  ;;  %v206_v46 = vmul.f32 %v113_v36, %v113_v36  ;;  %v183_v49 = vadd.f32 %v113_v36, %v111_v32 }
  0xa8   :  { %v210_v0 = vmul.f32 %v123_v37, %v123_v37 }
  0xa9   :  { %299 = vst [vmem:[%s501_s2] sm:$0xff] %v298_v38   ;;  %v221_v50 = vadd.f32 %v206_v46, %v205_v47 }
  0xaa   :  { %336 = vst [vmem:[%s501_s2 + $0x10] sm:$0xff] %v308_v39  }
  0xad   :  { %v133_v40 = vpop.f32.mrf.mxu2  ;;  %v143_v41 = vpop.f32.mrf.mxu3 }
  0xae   :  { %v116_v42 = vpop.f32.mrf.mxu0  ;;  %v126_v43 = vpop.f32.mrf.mxu1  ;;  %v318_v44 = vpack.c.bf16 %v133_v40, %v131_v34  ;;  %v328_v45 = vpack.c.bf16 %v143_v41, %v463_v35  ;;  %v214_v16 = vmul.f32 %v133_v40, %v133_v40  ;;  %v218_v28 = vmul.f32 %v143_v41, %v143_v41 }
  0xaf   :  { %v207_v48 = vmul.f32 %v116_v42, %v116_v42  ;;  %v184_v51 = vadd.f32 %v183_v49, %v116_v42  ;;  %v211_v3 = vmul.f32 %v126_v43, %v126_v43 }
  0xb0   :  { %338 = vst [vmem:[%s501_s2 + $0x20] sm:$0xff] %v318_v44  }
  0xb1   :  { %340 = vst [vmem:[%s501_s2 + $0x30] sm:$0xff] %v328_v45   ;;  %v222_v54 = vadd.f32 %v221_v50, %v207_v48 }
  0xb5   :  { %v136_v52 = vpop.f32.mrf.mxu2  ;;  %v146_v53 = vpop.f32.mrf.mxu3 }
  0xb6   :  { %v118_v55 = vpop.f32.mrf.mxu0  ;;  %v128_v56 = vpop.f32.mrf.mxu1  ;;  %v215_v20 = vmul.f32 %v136_v52, %v136_v52  ;;  %v219_v32 = vmul.f32 %v146_v53, %v146_v53 }
  0xb7   :  { %v303_v57 = vpack.c.bf16 %v118_v55, %v116_v42  ;;  %v185_v58 = vadd.f32 %v184_v51, %v118_v55  ;;  %v208_v59 = vmul.f32 %v118_v55, %v118_v55  ;;  %v313_v60 = vpack.c.bf16 %v128_v56, %v126_v43 }
  0xb8   :  { %v212_v11 = vmul.f32 %v128_v56, %v128_v56 }
  0xb9   :  { %335 = vst [vmem:[%s501_s2 + $0x8] sm:$0xff] %v303_v57   ;;  %v186_v62 = vadd.f32 %v185_v58, %v121_v33  ;;  %v223_v63 = vadd.f32 %v222_v54, %v208_v59 }
  0xba   :  { %337 = vst [vmem:[%s501_s2 + $0x18] sm:$0xff] %v313_v60  }
  0xbb   :  { %v224_v1 = vadd.f32 %v223_v63, %v209_v61  ;;  %v187_v2 = vadd.f32 %v186_v62, %v123_v37 }
  0xbd   :  { %v188_v4 = vadd.f32 %v187_v2, %v126_v43  ;;  %v225_v5 = vadd.f32 %v224_v1, %v210_v0  ;;  %v138_v6 = vpop.f32.mrf.mxu2  ;;  %v148_v7 = vpop.f32.mrf.mxu3 }
  0xbe   :  { %v323_v8 = vpack.c.bf16 %v138_v6, %v136_v52  ;;  %v333_v9 = vpack.c.bf16 %v148_v7, %v146_v53  ;;  %v216_v24 = vmul.f32 %v138_v6, %v138_v6  ;;  %v220_v37 = vmul.f32 %v148_v7, %v148_v7 }
  0xbf   :  { %v189_v10 = vadd.f32 %v188_v4, %v128_v56  ;;  %v226_v12 = vadd.f32 %v225_v5, %v211_v3 }
  0xc0   :  { %339 = vst [vmem:[%s501_s2 + $0x28] sm:$0xff] %v323_v8  }
  0xc1   :  { %v190_v14 = vadd.f32 %v189_v10, %v131_v34  ;;  %v227_v15 = vadd.f32 %v226_v12, %v212_v11  ;;  %341 = vst [vmem:[%s501_s2 + $0x38] sm:$0xff] %v333_v9  }
  0xc3   :  { %v228_v17 = vadd.f32 %v227_v15, %v213_v13  ;;  %v191_v18 = vadd.f32 %v190_v14, %v133_v40 }
  0xc5   :  { %v192_v19 = vadd.f32 %v191_v18, %v136_v52  ;;  %v229_v21 = vadd.f32 %v228_v17, %v214_v16 }
  0xc7   :  { %v230_v22 = vadd.f32 %v229_v21, %v215_v20  ;;  %v193_v23 = vadd.f32 %v192_v19, %v138_v6 }
  0xc9   :  { %v194_v26 = vadd.f32 %v193_v23, %v463_v35  ;;  %v231_v27 = vadd.f32 %v230_v22, %v216_v24 }
  0xcb   :  { %v232_v29 = vadd.f32 %v231_v27, %v217_v25  ;;  %v195_v30 = vadd.f32 %v194_v26, %v143_v41 }
  0xcd   :  { %v196_v31 = vadd.f32 %v195_v30, %v146_v53  ;;  %v233_v33 = vadd.f32 %v232_v29, %v218_v28 }
  0xcf   :  { %v234_v34 = vadd.f32 %v233_v33, %v219_v32  ;;  %v197_v36 = vadd.f32 %v196_v31, %v148_v7 }
  0xd1   :  { %v198_v38 = vrot.slane %v197_v36, 4  ;;  %v235_v39 = vadd.f32 %v234_v34, %v220_v37 }
  0xd3   :  { %v199_v40 = vadd.f32 %v198_v38, %v197_v36  ;;  %v236_v42 = vrot.slane %v235_v39, 4 }
  0xd5   :  { %v200_v43 = vrot.slane %v199_v40, 2  ;;  %v237_v44 = vadd.f32 %v236_v42, %v235_v39 }
  0xd7   :  { %v201_v45 = vadd.f32 %v200_v43, %v199_v40  ;;  %v238_v46 = vrot.slane %v237_v44, 2 }
  0xd9   :  { %v202_v47 = vrot.slane %v201_v45, 1  ;;  %v239_v35 = vadd.f32 %v238_v46, %v237_v44 }
  0xdb   :  { %v203_v48 = vadd.f32 %v202_v47, %v201_v45  ;;  %v240_v49 = vrot.slane %v239_v35, 1 }
  0xdd   :  { %204 = vst [vmem:[%s502_s3] sm:$0xff] %v203_v48  ;;  %v241_v41 = vadd.f32 %v240_v49, %v239_v35 }
  0xdf   :  { %242 = vst [vmem:[%s503_s4] sm:$0xff] %v241_v41 }

// kernel: bottleneck_forward.7
= control target key start
LH: loop header
LB: loop body
LE: loop exit
PB: predicated region body
PF: predicated region fallthrough
CT: control target
= control target key end

     0   :  { %s387_s0 = inlined_call_operand.vmem [shape: bf16[128,128], index: 0, kind: input, shape index: {}]   ;;  %s388_s1 = inlined_call_operand.vmem [shape: f32[1,128], index: 1, kind: input, shape index: {}]   ;;  %s389_s2 = inlined_call_operand.vmem [shape: f32[1,128], index: 2, kind: input, shape index: {}]   ;;  %s390_s3 = inlined_call_operand.vmem [shape: f32[128,128], index: 3, kind: input, shape index: {}]   ;;  %s391_s4 = inlined_call_operand.hbm [shape: f32[128,128], index: 4, kind: output, shape index: {}]  }
   0x1   :  { %v173_v0 = vld [vmem:[%s387_s0] sm:$0xff]   ;;  %v204_v5 = vld [vmem:[%s387_s0 + $0x8] sm:$0xff]   ;;  %v205_v10 = vld [vmem:[%s387_s0 + $0x10] sm:$0xff]  }
   0x2   :  { %v276_v1 = vld [vmem:[%s388_s1] ss:$0 sm:$0xff]  ;;  %v174_v2 = vunpack.c.l.bf16 %v173_v0  ;;  %v175_v4 = vunpack.c.h.bf16 %v173_v0  ;;  %v178_v8 = vunpack.c.l.bf16 %v204_v5  ;;  %v179_v9 = vunpack.c.h.bf16 %v204_v5  ;;  %v91_v12 = vld [vmem:[%s390_s3 + $0x8] sm:$0xff]  ;;  %v206_v15 = vld [vmem:[%s387_s0 + $0x18] sm:$0xff]  }
   0x3   :  { %v281_v3 = vld [vmem:[%s389_s2] ss:$0 sm:$0xff]  ;;  %v182_v13 = vunpack.c.l.bf16 %v205_v10  ;;  %v183_v14 = vunpack.c.h.bf16 %v205_v10  ;;  %v92_v20 = vld [vmem:[%s390_s3 + $0x10] sm:$0xff]  ;;  %v93_v21 = vld [vmem:[%s390_s3 + $0x18] sm:$0xff]  ;;  %v186_v24 = vunpack.c.l.bf16 %v206_v15  ;;  %v187_v25 = vunpack.c.h.bf16 %v206_v15 }
   0x4   :  { %v54_v6 = vmul.f32 %v276_v1, %v174_v2  ;;  %v55_v7 = vmul.f32 %v276_v1, %v175_v4  ;;  %v90_v11 = vld [vmem:[%s390_s3] sm:$0xff]  ;;  %v56_v18 = vmul.f32 %v276_v1, %v178_v8  ;;  %v57_v19 = vmul.f32 %v276_v1, %v179_v9  ;;  %v95_v31 = vld [vmem:[%s390_s3 + $0x28] sm:$0xff]  ;;  %v96_v41 = vld [vmem:[%s390_s3 + $0x30] sm:$0xff] }
   0x5   :  { %v58_v22 = vmul.f32 %v276_v1, %v182_v13  ;;  %v59_v23 = vmul.f32 %v276_v1, %v183_v14  ;;  %v94_v30 = vld [vmem:[%s390_s3 + $0x20] sm:$0xff]  ;;  %v60_v34 = vmul.f32 %v276_v1, %v186_v24  ;;  %v61_v35 = vmul.f32 %v276_v1, %v187_v25  ;;  %v97_v42 = vld [vmem:[%s390_s3 + $0x38] sm:$0xff] }
   0x6   :  { %v74_v16 = vadd.f32 %v281_v3, %v54_v6  ;;  %v75_v17 = vadd.f32 %v281_v3, %v55_v7  ;;  %v76_v28 = vadd.f32 %v281_v3, %v56_v18  ;;  %v77_v29 = vadd.f32 %v281_v3, %v57_v19  ;;  %v207_v36 = vld [vmem:[%s387_s0 + $0x20] sm:$0xff]  }
   0x7   :  { %v78_v32 = vadd.f32 %v281_v3, %v58_v22  ;;  %v79_v33 = vadd.f32 %v281_v3, %v59_v23 }
   0x8   :  { %v106_v26 = vadd.f32 %v90_v11, %v74_v16  ;;  %v107_v27 = vadd.f32 %v91_v12, %v75_v17  ;;  %v108_v39 = vadd.f32 %v92_v20, %v76_v28  ;;  %v109_v40 = vadd.f32 %v93_v21, %v77_v29 }
   0xa   :  { %v122_v37 = vmax.f32 %v106_v26, 0.0  ;;  %v123_v38 = vmax.f32 %v107_v27, 0.0 }
   0xb   :  { %9 = vsyncpa [#allocation3], 0  ;;  %v110_v43 = vadd.f32 %v94_v30, %v78_v32  ;;  %v111_v44 = vadd.f32 %v95_v31, %v79_v33  ;;  %v80_v45 = vadd.f32 %v281_v3, %v60_v34  ;;  %v81_v46 = vadd.f32 %v281_v3, %v61_v35  ;;  %v208_v47 = vld [vmem:[%s387_s0 + $0x28] sm:$0xff]   ;;  %v209_v52 = vld [vmem:[%s387_s0 + $0x30] sm:$0xff]   ;;  %s242_s10 = smov [#allocation2]   ;;  %s243_s14 = smov 128  }
   0xc   :  { %138 = vst [vmem:[#allocation2] sm:$0xff] %v122_v37  ;;  %v124_v48 = vmax.f32 %v108_v39, 0.0  ;;  %v125_v49 = vmax.f32 %v109_v40, 0.0  ;;  %v190_v50 = vunpack.c.l.bf16 %v207_v36  ;;  %v191_v51 = vunpack.c.h.bf16 %v207_v36  ;;  %v210_v61 = vld [vmem:[%s387_s0 + $0x38] sm:$0xff]   ;;  %v98_v0 = vld [vmem:[%s390_s3 + $0x40] sm:$0xff]  ;;  %v99_v2 = vld [vmem:[%s390_s3 + $0x48] sm:$0xff] }
   0xd   :  { %139 = vst [vmem:[#allocation2 + $0x8] sm:$0xff] %v123_v38  ;;  %v126_v53 = vmax.f32 %v110_v43, 0.0  ;;  %v127_v54 = vmax.f32 %v111_v44, 0.0  ;;  %v112_v55 = vadd.f32 %v96_v41, %v80_v45  ;;  %v113_v56 = vadd.f32 %v97_v42, %v81_v46  ;;  %v100_v10 = vld [vmem:[%s390_s3 + $0x50] sm:$0xff]  ;;  %v101_v11 = vld [vmem:[%s390_s3 + $0x58] sm:$0xff]  ;;  %v102_v20 = vld [vmem:[%s390_s3 + $0x60] sm:$0xff] }
   0xe   :  { %140 = vst [vmem:[#allocation2 + $0x10] sm:$0xff] %v124_v48  ;;  %v62_v57 = vmul.f32 %v276_v1, %v190_v50  ;;  %v63_v58 = vmul.f32 %v276_v1, %v191_v51  ;;  %v194_v59 = vunpack.c.l.bf16 %v208_v47  ;;  %v195_v60 = vunpack.c.h.bf16 %v208_v47  ;;  %v103_v21 = vld [vmem:[%s390_s3 + $0x68] sm:$0xff]  ;;  %v104_v30 = vld [vmem:[%s390_s3 + $0x70] sm:$0xff]  ;;  %v105_v31 = vld [vmem:[%s390_s3 + $0x78] sm:$0xff]  ;;  %s158_s11 = sshll.u32 %s242_s10, 4  ;;  %s160_s3 = sshll.u32 %s391_s4, 4  ;;  %s159_s11 = int_to_ptr.vmem [resolvable:$true] %s158_s11  ;;  %s161_s3 = int_to_ptr.hbm [resolvable:$true] %s160_s3 }
   0xf   :  { %141 = vst [vmem:[#allocation2 + $0x18] sm:$0xff] %v125_v49  ;;  %v128_v62 = vmax.f32 %v112_v55, 0.0  ;;  %v129_v63 = vmax.f32 %v113_v56, 0.0  ;;  %v198_v4 = vunpack.c.l.bf16 %v209_v52  ;;  %v199_v5 = vunpack.c.h.bf16 %v209_v52  ;;  %s244_s15 = smov 8  }
  0x10   :  { %142 = vst [vmem:[#allocation2 + $0x20] sm:$0xff] %v126_v53  ;;  %v82_v6 = vadd.f32 %v281_v3, %v62_v57  ;;  %v83_v7 = vadd.f32 %v281_v3, %v63_v58  ;;  %v64_v8 = vmul.f32 %v276_v1, %v194_v59  ;;  %v65_v9 = vmul.f32 %v276_v1, %v195_v60 }
  0x11   :  { %143 = vst [vmem:[#allocation2 + $0x28] sm:$0xff] %v127_v54  ;;  %v66_v12 = vmul.f32 %v276_v1, %v198_v4  ;;  %v67_v13 = vmul.f32 %v276_v1, %v199_v5  ;;  %v202_v14 = vunpack.c.l.bf16 %v210_v61  ;;  %v203_v15 = vunpack.c.h.bf16 %v210_v61 }
  0x12   :  { %144 = vst [vmem:[#allocation2 + $0x30] sm:$0xff] %v128_v62  ;;  %v114_v16 = vadd.f32 %v98_v0, %v82_v6  ;;  %v115_v17 = vadd.f32 %v99_v2, %v83_v7  ;;  %v84_v18 = vadd.f32 %v281_v3, %v64_v8  ;;  %v85_v19 = vadd.f32 %v281_v3, %v65_v9 }
  0x13   :  { %145 = vst [vmem:[#allocation2 + $0x38] sm:$0xff] %v129_v63  ;;  %v86_v22 = vadd.f32 %v281_v3, %v66_v12  ;;  %v87_v23 = vadd.f32 %v281_v3, %v67_v13  ;;  %v68_v24 = vmul.f32 %v276_v1, %v202_v14  ;;  %v69_v25 = vmul.f32 %v276_v1, %v203_v15 }
  0x14   :  { %v130_v26 = vmax.f32 %v114_v16, 0.0  ;;  %v131_v27 = vmax.f32 %v115_v17, 0.0  ;;  %v116_v28 = vadd.f32 %v100_v10, %v84_v18  ;;  %v117_v29 = vadd.f32 %v101_v11, %v85_v19 }
  0x15   :  { %v118_v32 = vadd.f32 %v102_v20, %v86_v22  ;;  %v119_v33 = vadd.f32 %v103_v21, %v87_v23  ;;  %v88_v34 = vadd.f32 %v281_v3, %v68_v24  ;;  %v89_v35 = vadd.f32 %v281_v3, %v69_v25 }
  0x16   :  { %146 = vst [vmem:[#allocation2 + $0x40] sm:$0xff] %v130_v26  ;;  %v132_v1 = vmax.f32 %v116_v28, 0.0  ;;  %v133_v36 = vmax.f32 %v117_v29, 0.0 }
  0x17   :  { %147 = vst [vmem:[#allocation2 + $0x48] sm:$0xff] %v131_v27  ;;  %v134_v37 = vmax.f32 %v118_v32, 0.0  ;;  %v135_v38 = vmax.f32 %v119_v33, 0.0  ;;  %v120_v39 = vadd.f32 %v104_v30, %v88_v34  ;;  %v121_v40 = vadd.f32 %v105_v31, %v89_v35 }
  0x18   :  { %148 = vst [vmem:[#allocation2 + $0x50] sm:$0xff] %v132_v1 }
  0x19   :  { %149 = vst [vmem:[#allocation2 + $0x58] sm:$0xff] %v133_v36  ;;  %v136_v41 = vmax.f32 %v120_v39, 0.0  ;;  %v137_v42 = vmax.f32 %v121_v40, 0.0 }
  0x1a   :  { %150 = vst [vmem:[#allocation2 + $0x60] sm:$0xff] %v134_v37 }
  0x1b   :  { %151 = vst [vmem:[#allocation2 + $0x68] sm:$0xff] %v135_v38 }
  0x1c   :  { %152 = vst [vmem:[#allocation2 + $0x70] sm:$0xff] %v136_v41 }
  0x1d   :  { %153 = vst [vmem:[#allocation2 + $0x78] sm:$0xff] %v137_v42 }
  0x1e   :  { %166 = dma.vmem_to_hbm [thread:$0]  %s159_s11, 2048, %s161_s3, [#allocation3], %s243_s14, %s243_s14, %s244_s15  }
  0x1f   :  { %240 = dma.done.wait [#allocation3], 2048  }
  0x20   :  { %241 = vsyncadd [#allocation3], 4294965248 }
  0x21   :  { %171 = vsyncpa [#allocation3], 1 }

// kernel: bottleneck_forward.6
= control target key start
LH: loop header
LB: loop body
LE: loop exit
PB: predicated region body
PF: predicated region fallthrough
CT: control target
= control target key end

     0   :  { %s646_s1 = inlined_call_operand.vmem [shape: bf16[128,128], index: 1, kind: input, shape index: {}]   ;;  %s647_s2 = inlined_call_operand.vmem [shape: f32[1,128], index: 2, kind: input, shape index: {}]   ;;  %s648_s3 = inlined_call_operand.vmem [shape: f32[1,128], index: 3, kind: input, shape index: {}]   ;;  %s649_s0 = inlined_call_operand.vmem [shape: bf16[128,128], index: 0, kind: input, shape index: {}]   ;;  %s650_s4 = inlined_call_operand.vmem [shape: bf16[128,128], index: 4, kind: output, shape index: {0}]   ;;  %s651_s5 = inlined_call_operand.vmem [shape: f32[1,8,128], index: 5, kind: output, shape index: {1}]   ;;  %s652_s6 = inlined_call_operand.vmem [shape: f32[1,8,128], index: 6, kind: output, shape index: {2}]  }
   0x1   :  { %v372_v0 = vld [vmem:[%s646_s1 + $0x38] sm:$0xff]  ;;  %v371_v1 = vld [vmem:[%s646_s1 + $0x30] sm:$0xff]  ;;  %v370_v2 = vld [vmem:[%s646_s1 + $0x28] sm:$0xff] }
   0x2   :  { %180 = vmatpush.bf16.msra.mxu0 %v372_v0  ;;  %459 = vmatpush.bf16.msra.mxu1 %v372_v0  ;;  %v374_v3 = vld [vmem:[%s649_s0] sm:$0xff]   ;;  %v446_v5 = vld [vmem:[%s649_s0 + $0x10] sm:$0xff]   ;;  %v368_v15 = vld [vmem:[%s646_s1 + $0x18] sm:$0xff] }
   0x3   :  { %460 = vmatpush.bf16.msra.mxu2 %v372_v0  ;;  %461 = vmatpush.bf16.msra.mxu3 %v372_v0  ;;  %v369_v4 = vld [vmem:[%s646_s1 + $0x20] sm:$0xff]  ;;  %v450_v7 = vld [vmem:[%s649_s0 + $0x30] sm:$0xff]   ;;  %v375_v8 = vunpack.c.l.bf16 %v374_v3  ;;  %v376_v9 = vunpack.c.h.bf16 %v374_v3  ;;  %v383_v11 = vunpack.c.l.bf16 %v446_v5  ;;  %v384_v12 = vunpack.c.h.bf16 %v446_v5  ;;  %v366_v34 = vld [vmem:[%s646_s1 + $0x8] sm:$0xff] }
   0x4   :  { %v448_v6 = vld [vmem:[%s649_s0 + $0x20] sm:$0xff]   ;;  %v399_v16 = vunpack.c.l.bf16 %v450_v7  ;;  %v400_v17 = vunpack.c.h.bf16 %v450_v7  ;;  %v367_v25 = vld [vmem:[%s646_s1 + $0x10] sm:$0xff]  ;;  %v445_v43 = vld [vmem:[%s649_s0 + $0x8] sm:$0xff]  }
   0x5   :  { %v547_v10 = vld [vmem:[%s647_s2] ss:$0 sm:$0xff]  ;;  %v391_v13 = vunpack.c.l.bf16 %v448_v6  ;;  %v392_v14 = vunpack.c.h.bf16 %v448_v6  ;;  %v447_v44 = vld [vmem:[%s649_s0 + $0x18] sm:$0xff]   ;;  %v449_v48 = vld [vmem:[%s649_s0 + $0x28] sm:$0xff]   ;;  %v379_v51 = vunpack.c.l.bf16 %v445_v43  ;;  %v380_v52 = vunpack.c.h.bf16 %v445_v43 }
   0x6   :  { %181 = vmatpush.bf16.msra.mxu0 %v371_v1  ;;  %462 = vmatpush.bf16.msra.mxu1 %v371_v1  ;;  %v56_v18 = vmul.f32 %v547_v10, %v375_v8  ;;  %v57_v19 = vmul.f32 %v547_v10, %v376_v9  ;;  %v557_v20 = vld [vmem:[%s648_s3] ss:$0 sm:$0xff]  ;;  %v60_v21 = vmul.f32 %v547_v10, %v383_v11  ;;  %v451_v49 = vld [vmem:[%s649_s0 + $0x38] sm:$0xff]   ;;  %v387_v53 = vunpack.c.l.bf16 %v447_v44 }
   0x7   :  { %463 = vmatpush.bf16.msra.mxu2 %v371_v1  ;;  %464 = vmatpush.bf16.msra.mxu3 %v371_v1  ;;  %v61_v22 = vmul.f32 %v547_v10, %v384_v12  ;;  %v64_v23 = vmul.f32 %v547_v10, %v391_v13  ;;  %v65_v24 = vmul.f32 %v547_v10, %v392_v14  ;;  %v365_v45 = vld [vmem:[%s646_s1] sm:$0xff]  ;;  %v388_v56 = vunpack.c.h.bf16 %v447_v44 }
   0x8   :  { %v68_v26 = vmul.f32 %v547_v10, %v399_v16  ;;  %v69_v27 = vmul.f32 %v547_v10, %v400_v17  ;;  %v76_v28 = vadd.f32 %v557_v20, %v56_v18  ;;  %v77_v29 = vadd.f32 %v557_v20, %v57_v19 }
   0x9   :  { %v80_v30 = vadd.f32 %v557_v20, %v60_v21  ;;  %v81_v31 = vadd.f32 %v557_v20, %v61_v22  ;;  %v84_v32 = vadd.f32 %v557_v20, %v64_v23  ;;  %v85_v33 = vadd.f32 %v557_v20, %v65_v24 }
   0xa   :  { %182 = vmatpush.bf16.msra.mxu0 %v370_v2  ;;  %465 = vmatpush.bf16.msra.mxu1 %v370_v2  ;;  %v88_v35 = vadd.f32 %v557_v20, %v68_v26  ;;  %v89_v36 = vadd.f32 %v557_v20, %v69_v27  ;;  %v92_v37 = vmax.f32 %v76_v28, 0.0  ;;  %v93_v38 = vmax.f32 %v77_v29, 0.0 }
   0xb   :  { %466 = vmatpush.bf16.msra.mxu2 %v370_v2  ;;  %467 = vmatpush.bf16.msra.mxu3 %v370_v2  ;;  %v96_v39 = vmax.f32 %v80_v30, 0.0  ;;  %v97_v40 = vmax.f32 %v81_v31, 0.0  ;;  %v100_v41 = vmax.f32 %v84_v32, 0.0  ;;  %v101_v42 = vmax.f32 %v85_v33, 0.0 }
   0xc   :  { %v104_v46 = vmax.f32 %v88_v35, 0.0  ;;  %v105_v47 = vmax.f32 %v89_v36, 0.0  ;;  %v108_v50 = vpack.c.bf16 %v93_v38, %v92_v37  ;;  %v395_v57 = vunpack.c.l.bf16 %v449_v48 }
   0xd   :  { %v110_v54 = vpack.c.bf16 %v97_v40, %v96_v39  ;;  %v112_v55 = vpack.c.bf16 %v101_v42, %v100_v41  ;;  %v396_v59 = vunpack.c.h.bf16 %v449_v48  ;;  %v403_v60 = vunpack.c.l.bf16 %v451_v49 }
   0xe   :  { %183 = vmatpush.bf16.msra.mxu0 %v369_v4  ;;  %468 = vmatpush.bf16.msra.mxu1 %v369_v4  ;;  %v114_v58 = vpack.c.bf16 %v105_v47, %v104_v46  ;;  %v404_v61 = vunpack.c.h.bf16 %v451_v49  ;;  %v58_v62 = vmul.f32 %v547_v10, %v379_v51  ;;  %v59_v63 = vmul.f32 %v547_v10, %v380_v52 }
   0xf   :  { %469 = vmatpush.bf16.msra.mxu2 %v369_v4  ;;  %470 = vmatpush.bf16.msra.mxu3 %v369_v4  ;;  %v62_v0 = vmul.f32 %v547_v10, %v387_v53  ;;  %v63_v1 = vmul.f32 %v547_v10, %v388_v56  ;;  %v66_v2 = vmul.f32 %v547_v10, %v395_v57 }
  0x10   :  { %v67_v3 = vmul.f32 %v547_v10, %v396_v59  ;;  %v70_v4 = vmul.f32 %v547_v10, %v403_v60  ;;  %v71_v5 = vmul.f32 %v547_v10, %v404_v61  ;;  %v78_v6 = vadd.f32 %v557_v20, %v58_v62 }
  0x11   :  { %v79_v7 = vadd.f32 %v557_v20, %v59_v63  ;;  %v82_v8 = vadd.f32 %v557_v20, %v62_v0  ;;  %v83_v9 = vadd.f32 %v557_v20, %v63_v1  ;;  %v86_v11 = vadd.f32 %v557_v20, %v66_v2 }
  0x12   :  { %184 = vmatpush.bf16.msra.mxu0 %v368_v15  ;;  %471 = vmatpush.bf16.msra.mxu1 %v368_v15  ;;  %v87_v12 = vadd.f32 %v557_v20, %v67_v3  ;;  %v90_v13 = vadd.f32 %v557_v20, %v70_v4  ;;  %v91_v14 = vadd.f32 %v557_v20, %v71_v5 }
  0x13   :  { %472 = vmatpush.bf16.msra.mxu2 %v368_v15  ;;  %473 = vmatpush.bf16.msra.mxu3 %v368_v15  ;;  %v94_v15 = vmax.f32 %v78_v6, 0.0  ;;  %v95_v16 = vmax.f32 %v79_v7, 0.0  ;;  %v98_v17 = vmax.f32 %v82_v8, 0.0  ;;  %v99_v10 = vmax.f32 %v83_v9, 0.0 }
  0x14   :  { %v102_v18 = vmax.f32 %v86_v11, 0.0  ;;  %v103_v19 = vmax.f32 %v87_v12, 0.0  ;;  %v106_v21 = vmax.f32 %v90_v13, 0.0  ;;  %v107_v22 = vmax.f32 %v91_v14, 0.0 }
  0x15   :  { %v109_v23 = vpack.c.bf16 %v95_v16, %v94_v15  ;;  %v111_v24 = vpack.c.bf16 %v99_v10, %v98_v17 }
  0x16   :  { %185 = vmatpush.bf16.msra.mxu0 %v367_v25  ;;  %474 = vmatpush.bf16.msra.mxu1 %v367_v25  ;;  %v115_v26 = vpack.c.bf16 %v107_v22, %v106_v21 }
  0x17   :  { %475 = vmatpush.bf16.msra.mxu2 %v367_v25  ;;  %476 = vmatpush.bf16.msra.mxu3 %v367_v25  ;;  %v113_v25 = vpack.c.bf16 %v103_v19, %v102_v18 }
  0x1a   :  { %186 = vmatpush.bf16.msra.mxu0 %v366_v34  ;;  %477 = vmatpush.bf16.msra.mxu1 %v366_v34 }
  0x1b   :  { %478 = vmatpush.bf16.msra.mxu2 %v366_v34  ;;  %479 = vmatpush.bf16.msra.mxu3 %v366_v34 }
  0x1e   :  { %187 = vmatpush.bf16.msra.mxu0 %v365_v45  ;;  %480 = vmatpush.bf16.msra.mxu1 %v365_v45 }
  0x1f   :  { %481 = vmatpush.bf16.msra.mxu2 %v365_v45  ;;  %482 = vmatpush.bf16.msra.mxu3 %v365_v45 }
  0x21   :  { %188 = vmatmul.bf16.vlgmr.msra.gmra.mxu0 %v108_v50  ;;  %198 = vmatmul.bf16.vlgmr.msra.gmra.mxu1 %v110_v54 }
  0x22   :  { %208 = vmatmul.bf16.vlgmr.msra.gmra.mxu2 %v112_v55  ;;  %218 = vmatmul.bf16.vlgmr.msra.gmra.mxu3 %v114_v58 }
  0x31   :  { %193 = vmatmul.bf16.gmra.mxu0 %v109_v23  ;;  %203 = vmatmul.bf16.gmra.mxu1 %v111_v24 }
  0x32   :  { %213 = vmatmul.bf16.gmra.mxu2 %v113_v25  ;;  %223 = vmatmul.bf16.gmra.mxu3 %v115_v26 }
  0x9e   :  { %v189_v27 = vpop.f32.mrf.mxu0  ;;  %v199_v28 = vpop.f32.mrf.mxu1 }
  0x9f   :  { %v283_v41 = vmul.f32 %v189_v27, %v189_v27  ;;  %v287_v55 = vmul.f32 %v199_v28, %v199_v28 }
  0xa5   :  { %v209_v29 = vpop.f32.mrf.mxu2  ;;  %v610_v20 = vpop.f32.mrf.mxu3 }
  0xa6   :  { %v191_v30 = vpop.f32.mrf.mxu0  ;;  %v201_v31 = vpop.f32.mrf.mxu1  ;;  %v291_v7 = vmul.f32 %v209_v29, %v209_v29  ;;  %v295_v19 = vmul.f32 %v610_v20, %v610_v20 }
  0xa7   :  { %v408_v32 = vpack.c.bf16 %v191_v30, %v189_v27  ;;  %v418_v33 = vpack.c.bf16 %v201_v31, %v199_v28  ;;  %v284_v40 = vmul.f32 %v191_v30, %v191_v30  ;;  %v261_v43 = vadd.f32 %v191_v30, %v189_v27 }
  0xa8   :  { %v288_v58 = vmul.f32 %v201_v31, %v201_v31 }
  0xa9   :  { %409 = vst [vmem:[%s650_s4] sm:$0xff] %v408_v32   ;;  %v299_v44 = vadd.f32 %v284_v40, %v283_v41 }
  0xaa   :  { %453 = vst [vmem:[%s650_s4 + $0x10] sm:$0xff] %v418_v33  }
  0xad   :  { %v211_v34 = vpop.f32.mrf.mxu2  ;;  %v221_v35 = vpop.f32.mrf.mxu3 }
  0xae   :  { %v194_v36 = vpop.f32.mrf.mxu0  ;;  %v204_v37 = vpop.f32.mrf.mxu1  ;;  %v428_v38 = vpack.c.bf16 %v211_v34, %v209_v29  ;;  %v438_v39 = vpack.c.bf16 %v221_v35, %v610_v20  ;;  %v292_v11 = vmul.f32 %v211_v34, %v211_v34  ;;  %v296_v23 = vmul.f32 %v221_v35, %v221_v35 }
  0xaf   :  { %v285_v42 = vmul.f32 %v194_v36, %v194_v36  ;;  %v262_v45 = vadd.f32 %v261_v43, %v194_v36  ;;  %v289_v61 = vmul.f32 %v204_v37, %v204_v37 }
  0xb0   :  { %455 = vst [vmem:[%s650_s4 + $0x20] sm:$0xff] %v428_v38  }
  0xb1   :  { %457 = vst [vmem:[%s650_s4 + $0x30] sm:$0xff] %v438_v39   ;;  %v300_v48 = vadd.f32 %v299_v44, %v285_v42 }
  0xb5   :  { %v214_v46 = vpop.f32.mrf.mxu2  ;;  %v224_v47 = vpop.f32.mrf.mxu3 }
  0xb6   :  { %v196_v49 = vpop.f32.mrf.mxu0  ;;  %v206_v50 = vpop.f32.mrf.mxu1  ;;  %v293_v15 = vmul.f32 %v214_v46, %v214_v46  ;;  %v297_v27 = vmul.f32 %v224_v47, %v224_v47 }
  0xb7   :  { %v413_v51 = vpack.c.bf16 %v196_v49, %v194_v36  ;;  %v263_v52 = vadd.f32 %v262_v45, %v196_v49  ;;  %v286_v53 = vmul.f32 %v196_v49, %v196_v49  ;;  %v423_v54 = vpack.c.bf16 %v206_v50, %v204_v37 }
  0xb8   :  { %v290_v5 = vmul.f32 %v206_v50, %v206_v50 }
  0xb9   :  { %452 = vst [vmem:[%s650_s4 + $0x8] sm:$0xff] %v413_v51   ;;  %v264_v56 = vadd.f32 %v263_v52, %v199_v28  ;;  %v301_v57 = vadd.f32 %v300_v48, %v286_v53 }
  0xba   :  { %454 = vst [vmem:[%s650_s4 + $0x18] sm:$0xff] %v423_v54  }
  0xbb   :  { %v302_v59 = vadd.f32 %v301_v57, %v287_v55  ;;  %v265_v60 = vadd.f32 %v264_v56, %v201_v31 }
  0xbd   :  { %v266_v62 = vadd.f32 %v265_v60, %v204_v37  ;;  %v303_v63 = vadd.f32 %v302_v59, %v288_v58  ;;  %v216_v0 = vpop.f32.mrf.mxu2  ;;  %v226_v1 = vpop.f32.mrf.mxu3 }
  0xbe   :  { %v433_v2 = vpack.c.bf16 %v216_v0, %v214_v46  ;;  %v443_v3 = vpack.c.bf16 %v226_v1, %v224_v47  ;;  %v294_v18 = vmul.f32 %v216_v0, %v216_v0  ;;  %v298_v31 = vmul.f32 %v226_v1, %v226_v1 }
  0xbf   :  { %v267_v4 = vadd.f32 %v266_v62, %v206_v50  ;;  %v304_v6 = vadd.f32 %v303_v63, %v289_v61 }
  0xc0   :  { %456 = vst [vmem:[%s650_s4 + $0x28] sm:$0xff] %v433_v2  }
  0xc1   :  { %v268_v8 = vadd.f32 %v267_v4, %v209_v29  ;;  %v305_v9 = vadd.f32 %v304_v6, %v290_v5  ;;  %458 = vst [vmem:[%s650_s4 + $0x38] sm:$0xff] %v443_v3  }
  0xc3   :  { %v306_v12 = vadd.f32 %v305_v9, %v291_v7  ;;  %v269_v13 = vadd.f32 %v268_v8, %v211_v34 }
  0xc5   :  { %v270_v14 = vadd.f32 %v269_v13, %v214_v46  ;;  %v307_v16 = vadd.f32 %v306_v12, %v292_v11 }
  0xc7   :  { %v308_v17 = vadd.f32 %v307_v16, %v293_v15  ;;  %v271_v10 = vadd.f32 %v270_v14, %v216_v0 }
  0xc9   :  { %v272_v21 = vadd.f32 %v271_v10, %v610_v20  ;;  %v309_v22 = vadd.f32 %v308_v17, %v294_v18 }
  0xcb   :  { %v310_v24 = vadd.f32 %v309_v22, %v295_v19  ;;  %v273_v25 = vadd.f32 %v272_v21, %v221_v35 }
  0xcd   :  { %v274_v26 = vadd.f32 %v273_v25, %v224_v47  ;;  %v311_v28 = vadd.f32 %v310_v24, %v296_v23 }
  0xcf   :  { %v312_v29 = vadd.f32 %v311_v28, %v297_v27  ;;  %v275_v30 = vadd.f32 %v274_v26, %v226_v1 }
  0xd1   :  { %v276_v32 = vrot.slane %v275_v30, 4  ;;  %v313_v33 = vadd.f32 %v312_v29, %v298_v31 }
  0xd3   :  { %v277_v34 = vadd.f32 %v276_v32, %v275_v30  ;;  %v314_v36 = vrot.slane %v313_v33, 4 }
  0xd5   :  { %v278_v37 = vrot.slane %v277_v34, 2  ;;  %v315_v38 = vadd.f32 %v314_v36, %v313_v33 }
  0xd7   :  { %v279_v39 = vadd.f32 %v278_v37, %v277_v34  ;;  %v316_v40 = vrot.slane %v315_v38, 2 }
  0xd9   :  { %v280_v41 = vrot.slane %v279_v39, 1  ;;  %v317_v20 = vadd.f32 %v316_v40, %v315_v38 }
  0xdb   :  { %v281_v42 = vadd.f32 %v280_v41, %v279_v39  ;;  %v318_v43 = vrot.slane %v317_v20, 1 }
  0xdd   :  { %282 = vst [vmem:[%s651_s5] sm:$0xff] %v281_v42  ;;  %v319_v35 = vadd.f32 %v318_v43, %v317_v20 }
  0xdf   :  { %320 = vst [vmem:[%s652_s6] sm:$0xff] %v319_v35 }

// kernel: bottleneck_forward.5
= control target key start
LH: loop header
LB: loop body
LE: loop exit
PB: predicated region body
PF: predicated region fallthrough
CT: control target
= control target key end

     0   :  { %s2479_s21 = smov 0   ;;  %s3278_s0 = inlined_call_operand.vmem [shape: bf16[128,128], index: 0, kind: input, shape index: {}]   ;;  %s3279_s1 = inlined_call_operand.vmem [shape: bf16[3,384,128], index: 1, kind: input, shape index: {}]   ;;  %s3280_s2 = inlined_call_operand.vmem [shape: f32[1,128], index: 2, kind: input, shape index: {}]   ;;  %s3281_s3 = inlined_call_operand.vmem [shape: f32[1,128], index: 3, kind: input, shape index: {}]   ;;  %s3282_s4 = inlined_call_operand.vmem [shape: bf16[128,128], index: 4, kind: output, shape index: {0}]   ;;  %s3283_s5 = inlined_call_operand.vmem [shape: f32[2,8,128], index: 5, kind: output, shape index: {1}]   ;;  %s3284_s6 = inlined_call_operand.vmem [shape: f32[2,8,128], index: 6, kind: output, shape index: {2}]  }
   0x1 LB: > { %s2485_s22 = sadd.s32 4294967295, %s2440_s21   ;;  %p1784_p0 = scmp.ge.s32.totalorder %s2440_s21, 1  ;;  %s2440_s21 = sphi %s2479_s21, %s17_s21  }
   0x2   : > { %p218_p1 = scmp.lt.s32.totalorder %s2440_s21, 3 }
   0x4   : > { %p219_p2 = pnand %p1784_p0, %p218_p1 }
   0x5   : > { %s1785_s27 = sshll.u32 (!%p219_p2), %s2485_s22, 3  ;;  %p268_p4 = scmp.lt.s32.totalorder (!%p219_p2), %s2485_s22, 1 }
   0x6   : > { %222 = sbr.rel (%p219_p2) target bundleno = 345 (0x159), region = 36  ;;  %p257_p3 = scmp.lt.s32.totalorder (!%p219_p2), %s1785_s27, 15 }
   0xb   : > { %v2184_v0 = vld [vmem:[%s3279_s1 + $0x38] sm:$0xff]  ;;  %v338_v2 = vlaneseq  ;;  %v2183_v4 = vld [vmem:[%s3279_s1 + $0x30] sm:$0xff]  ;;  %v2442_v5 = vmov 0.0   ;;  %s3377_s27 = smov (!%p257_p3, %s1785_s27), 15  ;;  %v2182_v11 = vld [vmem:[%s3279_s1 + $0x28] sm:$0xff]  ;;  %vm3285_vm0 = vcmask 1040384  }
   0xc   : > { %v2200_v1 = vld [vmem:[%s3279_s1 + $0xb8] sm:$0xff]  ;;  %827 = vmatpush.bf16.msra.mxu0 %v2184_v0  ;;  %2291 = vmatpush.bf16.msra.mxu1 %v2184_v0  ;;  %325 = vst [vmem:[#allocation2] sm:$0xff] %v2442_v5  ;;  %v2199_v7 = vld [vmem:[%s3279_s1 + $0xb0] sm:$0xff]  ;;  %s1786_s12 = sshll.u32 %s3377_s27, 2  ;;  %v2198_v13 = vld [vmem:[%s3279_s1 + $0xa8] sm:$0xff]  ;;  %vm3286_vm5 = vcmask 1046528  }
   0xd   : > { %v2208_v3 = vld [vmem:[%s3279_s1 + $0xf8] sm:$0xff]  ;;  %v2503_v6 = vshrl.u32 %v338_v2, 7  ;;  %885 = vmatpush.bf16.msra.mxu2 %v2200_v1  ;;  %v2207_v8 = vld [vmem:[%s3279_s1 + $0xf0] sm:$0xff]  ;;  %328 = vst [vmem:[#allocation2 + $0x80] sm:$0xff] %v2442_v5  ;;  %s2527_s17 = scalar_lea.vmem %s3278_s0, %s1786_s12  ;;  %v2206_v14 = vld [vmem:[%s3279_s1 + $0xe8] sm:$0xff]  ;;  %vm3292_vm15 = vmmov 1   ;;  %s3246_s14 = scalar_lea.vmem %s3282_s4, %s1786_s12 }
   0xe   : > { %1151 = vmatpush.bf16.msra.mxu3 %v2208_v3  ;;  %v2250_v15 = vld [vmem:[%s2527_s17] sm:$0xff]   ;;  %v2285_v23 = vld [vmem:[%s2527_s17 + $0x8] sm:$0xff]   ;;  %v2286_v29 = vld [vmem:[%s2527_s17 + $0x10] sm:$0xff]   ;;  %v3344_v62 = vmov 0  ;;  %s3379_s22 = smov (!%p268_p4, %s2485_s22), 1 }
   0xf   : > { %v351_v9 = vand.u32 7, %v2503_v6  ;;  %v2515_v10 = vadd.s32 24, %v2503_v6  ;;  %v2530_v12 = vadd.s32 32, %v2503_v6  ;;  %v2251_v17 = vunpack.c.l.bf16 %v2250_v15  ;;  %v2543_v18 = vld [vmem:[%s3280_s2] ss:$0 sm:$0xff]  ;;  %v2589_v45 = vld [vmem:[%s2527_s17 + $0x18] sm:$0xff]  }
  0x10   : > { %828 = vmatpush.bf16.msra.mxu0 %v2183_v4  ;;  %2292 = vmatpush.bf16.msra.mxu1 %v2183_v4  ;;  %v2252_v20 = vunpack.c.h.bf16 %v2250_v15  ;;  %v2554_v21 = vld [vmem:[%s3281_s3] ss:$0 sm:$0xff]  ;;  %v2558_v24 = vadd.s32 8, %v2503_v6  ;;  %v2255_v27 = vunpack.c.l.bf16 %v2285_v23  ;;  %v2256_v28 = vunpack.c.h.bf16 %v2285_v23  ;;  %v2180_v46 = vld [vmem:[%s3279_s1 + $0x18] sm:$0xff]  ;;  %v2179_v1 = vld [vmem:[%s3279_s1 + $0x10] sm:$0xff]  ;;  %s1789_s27 = sshll.u32 %s3379_s22, 3 }
  0x11   : > { %886 = vmatpush.bf16.msra.mxu2 %v2199_v7  ;;  %v372_v16 = vand.u32 7, %v2515_v10  ;;  %vm2547_vm1 = vcmp.eq.s32.totalorder %v351_v9, 0  ;;  %v2181_v25 = vld [vmem:[%s3279_s1 + $0x20] sm:$0xff]  ;;  %v296_v26 = vmul.f32 %v2543_v18, %v2251_v17  ;;  %v379_v30 = vand.u32 7, %v2530_v12  ;;  %v2196_v51 = vld [vmem:[%s3279_s1 + $0x98] sm:$0xff]  ;;  %v2178_v23 = vld [vmem:[%s3279_s1 + $0x8] sm:$0xff]  ;;  %s271_s16 = scalar_lea.vmem %s3283_s5, %s1789_s27  ;;  %s275_s19 = scalar_lea.vmem %s3284_s6, %s1789_s27 }
  0x12   : > { %1152 = vmatpush.bf16.msra.mxu3 %v2207_v8  ;;  %v2197_v31 = vld [vmem:[%s3279_s1 + $0xa0] sm:$0xff]  ;;  %v2259_v34 = vunpack.c.l.bf16 %v2286_v29  ;;  %v297_v36 = vmul.f32 %v2543_v18, %v2252_v20  ;;  %v298_v38 = vmul.f32 %v2543_v18, %v2255_v27  ;;  %v299_v39 = vmul.f32 %v2543_v18, %v2256_v28  ;;  %v2204_v52 = vld [vmem:[%s3279_s1 + $0xd8] sm:$0xff]  ;;  %v2195_v8 = vld [vmem:[%s3279_s1 + $0x90] sm:$0xff] }
  0x13   : > { %v451_v22 = vld [vmem:[#allocation2] sm:$0x80]  ;;  %vm2574_vm2 = vcmp.eq.s32.totalorder %v372_v16, 0  ;;  %v308_v37 = vadd.f32 %v2554_v21, %v296_v26  ;;  %v2583_v40 = vadd.s32 16, %v2503_v6  ;;  %v358_v43 = vand.u32 7, %v2558_v24  ;;  %v2194_v24 = vld [vmem:[%s3279_s1 + $0x88] sm:$0xff]  ;;  %vm3289_vm14 = vmneg %vm2547_vm1 }
  0x14   : > { %829 = vmatpush.bf16.msra.mxu0 %v2182_v11  ;;  %2293 = vmatpush.bf16.msra.mxu1 %v2182_v11  ;;  %v2205_v32 = vld [vmem:[%s3279_s1 + $0xe0] sm:$0xff]  ;;  %v486_v33 = vrot.slane %v451_v22, 7  ;;  %v300_v41 = vmul.f32 %v2543_v18, %v2259_v34  ;;  %v309_v42 = vadd.f32 %v2554_v21, %v297_v36  ;;  %v2260_v44 = vunpack.c.h.bf16 %v2286_v29  ;;  %v2203_v11 = vld [vmem:[%s3279_s1 + $0xd0] sm:$0xff]  ;;  %v2202_v28 = vld [vmem:[%s3279_s1 + $0xc8] sm:$0xff] }
  0x15   : > { %887 = vmatpush.bf16.msra.mxu2 %v2198_v13  ;;  %v2594_v47 = vmax.f32 %v308_v37, 0.0  ;;  %v310_v48 = vadd.f32 %v2554_v21, %v298_v38  ;;  %v311_v49 = vadd.f32 %v2554_v21, %v299_v39  ;;  %vm2600_vm3 = vcmp.eq.s32.totalorder %v379_v30, 0  ;;  %v2231_v19 = vld [vmem:[%s3279_s1 + $0x1b0] sm:$0xff]  ;;  %v2210_v35 = vld [vmem:[%s3279_s1 + $0x108] sm:$0xff]  ;;  %v2233_v50 = vld [vmem:[%s3279_s1 + $0x1c0] sm:$0xff] }
  0x16   : > { %1153 = vmatpush.bf16.msra.mxu3 %v2206_v14  ;;  %v312_v53 = vadd.f32 %v2554_v21, %v300_v41  ;;  %v2611_v54 = vmax.f32 %v309_v42, 0.0  ;;  %v2263_v55 = vunpack.c.l.bf16 %v2589_v45  ;;  %v301_v56 = vmul.f32 %v2543_v18, %v2260_v44  ;;  %v2177_v44 = vld [vmem:[%s3279_s1] sm:$0xff] }
  0x17   : > { %330 = vst [vmem:[#allocation2 + $0x20] sm:$0xff] %v2594_v47  ;;  %v487_v57 = vrot.slane %v2594_v47, 7  ;;  %v2617_v58 = vmax.f32 %v310_v48, 0.0  ;;  %v2619_v59 = vmax.f32 %v311_v49, 0.0  ;;  %v365_v60 = vand.u32 7, %v2583_v40  ;;  %v2193_v49 = vld [vmem:[%s3279_s1 + $0x80] sm:$0xff] }
  0x18   : > { %830 = vmatpush.bf16.msra.mxu0 %v2181_v25  ;;  %2294 = vmatpush.bf16.msra.mxu1 %v2181_v25  ;;  %v2622_v61 = vmax.f32 %v312_v53, 0.0  ;;  %vm2624_vm4 = vcmp.eq.s32.totalorder %v358_v43, 0  ;;  %v489_v63 = vrot.slane %v2611_v54, 7  ;;  %v302_v0 = vmul.f32 %v2543_v18, %v2263_v55  ;;  %v2242_v53 = vld [vmem:[%s3279_s1 + $0x208] sm:$0xff] }
  0x19   : > { %888 = vmatpush.bf16.msra.mxu2 %v2197_v31  ;;  %v2634_v2 = vsel %vm3285_vm0, %v486_v33, %v487_v57  ;;  %v491_v3 = vrot.slane %v2617_v58, 7  ;;  %v493_v4 = vrot.slane %v2619_v59, 7  ;;  %v313_v7 = vadd.f32 %v2554_v21, %v301_v56  ;;  %v2201_v56 = vld [vmem:[%s3279_s1 + $0xc0] sm:$0xff] }
  0x1a   : > { %1154 = vmatpush.bf16.msra.mxu3 %v2205_v32  ;;  %v495_v13 = vrot.slane %v2622_v61, 7  ;;  %v2647_v14 = vsel %vm3285_vm0, %v487_v57, %v489_v63  ;;  %v314_v15 = vadd.f32 %v2554_v21, %v302_v0  ;;  %vm2653_vm6 = vcmp.eq.s32.totalorder %v365_v60, 0  ;;  %v2216_v57 = vld [vmem:[%s3279_s1 + $0x138] sm:$0xff] }
  0x1b   : > { %v2651_v17 = vsel %vm3285_vm0, %v491_v3, %v493_v4  ;;  %v2658_v22 = vsel %vm3285_vm0, %v489_v63, %v491_v3  ;;  %vm2671_vm7 = vcmp.eq.s32.totalorder %v351_v9, 7  ;;  %v551_v27 = vrot.slane %v2611_v54, 1  ;;  %v2191_v3 = vld [vmem:[%s3279_s1 + $0x70] sm:$0xff] }
  0x1c   : > { %831 = vmatpush.bf16.msra.mxu0 %v2180_v46  ;;  %2295 = vmatpush.bf16.msra.mxu1 %v2180_v46  ;;  %v2667_v25 = vsel %vm3285_vm0, %v493_v4, %v495_v13  ;;  %v2679_v29 = vmax.f32 %v313_v7, 0.0  ;;  %v2681_v31 = vmax.f32 %v314_v15, 0.0  ;;  %v2684_v9 = vadd.s32 40, %v2503_v6 }
  0x1d   : > { %889 = vmatpush.bf16.msra.mxu2 %v2196_v51  ;;  %v2687_v33 = vadd.s32 48, %v2503_v6  ;;  %vm2691_vm8 = vcmp.eq.s32.totalorder %v358_v43, 7  ;;  %v553_v41 = vrot.slane %v2617_v58, 1  ;;  %v555_v42 = vrot.slane %v2619_v59, 1  ;;  %v2192_v51 = vld [vmem:[%s3279_s1 + $0x78] sm:$0xff] }
  0x1e   : > { %1155 = vmatpush.bf16.msra.mxu3 %v2204_v52  ;;  %v527_v32 = vld [vmem:[#allocation2 + $0x20] sm:$0xfe]  ;;  %v497_v36 = vrot.slane %v2679_v29, 7  ;;  %v499_v37 = vrot.slane %v2681_v31, 7  ;;  %v386_v39 = vand.u32 7, %v2684_v9  ;;  %vm2740_vm11 = vcmp.eq.s32.totalorder %v365_v60, 7 }
  0x1f   : > { %v550_v34 = vrot.slane %v527_v32, 1  ;;  %v393_v40 = vand.u32 7, %v2687_v33  ;;  %v2732_v55 = vsel %vm3286_vm5, %v551_v27, %v553_v41  ;;  %v3325_v63 = vmov 0  ;;  %v2190_v32 = vld [vmem:[%s3279_s1 + $0x68] sm:$0xff]  ;;  %v2187_v9 = vld [vmem:[%s3279_s1 + $0x50] sm:$0xff] }
  0x20   : > { %832 = vmatpush.bf16.msra.mxu0 %v2179_v1  ;;  %2296 = vmatpush.bf16.msra.mxu1 %v2179_v1  ;;  %v2706_v43 = vsel %vm3285_vm0, %v495_v13, %v497_v36  ;;  %v2711_v48 = vsel %vm3285_vm0, %v497_v36, %v499_v37  ;;  %vm2721_vm9 = vcmp.eq.s32.totalorder %v386_v39, 0  ;;  %v3326_v63 = vsel %vm2740_vm11, 4294967295, %v3325_v63  ;;  %v2240_v1 = vld [vmem:[%s3279_s1 + $0x1f8] sm:$0xff]  ;;  %vm2319_vm0 = vmpackc.low %vm3289_vm14, %vm3292_vm15  ;;  %v2219_v52 = vld [vmem:[%s3279_s1 + $0x150] sm:$0xff] }
  0x21   : > { %890 = vmatpush.bf16.msra.mxu2 %v2195_v8  ;;  %v2703_v46 = vsel %vm3286_vm5, %v550_v34, %v551_v27  ;;  %vm2727_vm10 = vcmp.eq.s32.totalorder %v393_v40, 0  ;;  %v2745_v0 = vsel %vm3286_vm5, %v553_v41, %v555_v42  ;;  %vm2755_vm12 = vcmp.eq.s32.totalorder %v372_v16, 7  ;;  %v2215_v8 = vld [vmem:[%s3279_s1 + $0x130] sm:$0xff]  ;;  %vm3290_vm5 = vmneg %vm2600_vm3  ;;  %v2189_v41 = vld [vmem:[%s3279_s1 + $0x60] sm:$0xff] }
  0x22   : > { %1156 = vmatpush.bf16.msra.mxu3 %v2203_v11  ;;  %v3327_v60 = vmov 0  ;;  %v557_v4 = vrot.slane %v2622_v61, 1  ;;  %v559_v7 = vrot.slane %v2679_v29, 1  ;;  %v2232_v11 = vld [vmem:[%s3279_s1 + $0x1b8] sm:$0xff]  ;;  %vm2769_vm13 = vcmp.eq.s32.totalorder %v379_v30, 7 }
  0x23   : > { %v3328_v60 = vsel %vm2755_vm12, 4294967295, %v3327_v60  ;;  %v3329_v10 = vmov 0  ;;  %v2264_v16 = vunpack.c.h.bf16 %v2589_v45  ;;  %v2320_v13 = vpack.c.bf16 %v2634_v2, %v2442_v5  ;;  %vm3291_vm12 = vmneg %vm2574_vm2 }
  0x24   : > { %833 = vmatpush.bf16.msra.mxu0 %v2178_v23  ;;  %2297 = vmatpush.bf16.msra.mxu1 %v2178_v23  ;;  %v3330_v10 = vsel %vm2769_vm13, 4294967295, %v3329_v10  ;;  %vm2792_vm13 = vmpackc.low %vm3290_vm5, %vm3291_vm12  ;;  %v2798_v30 = vpack.c.bf16 %v2667_v25, %v2651_v17  ;;  %v2329_v23 = vpack.c.bf16 %v2703_v46, %v2442_v5  ;;  %v2988_v20 = vpack.c.bf16 %v2622_v61, %v2619_v59 }
  0x25   : > { %891 = vmatpush.bf16.msra.mxu2 %v2194_v24  ;;  %vm3294_vm5 = vmneg %vm2671_vm7  ;;  %v2239_v24 = vld [vmem:[%s3279_s1 + $0x1f0] sm:$0xff]  ;;  %v303_v27 = vmul.f32 %v2543_v18, %v2264_v16  ;;  %v2214_v18 = vld [vmem:[%s3279_s1 + $0x128] sm:$0xff]  ;;  %v2913_v16 = vpack.c.bf16 %v2658_v22, %v2647_v14  ;;  %v2389_v12 = vpack.c.bf16 %v2732_v55, %v2703_v46 }
  0x26   : > { %1157 = vmatpush.bf16.msra.mxu3 %v2202_v28  ;;  %vm2328_vm12 = vmpackc.low %vm3294_vm5, %vm3292_vm15  ;;  %v2334_v28 = vpack.c.bf16 %v2647_v14, %v2634_v2  ;;  %v2238_v2 = vld [vmem:[%s3279_s1 + $0x1e8] sm:$0xff]  ;;  %v2934_v14 = vpack.c.bf16 %v2711_v48, %v2706_v43 }
  0x27   : > { %v315_v34 = vadd.f32 %v2554_v21, %v303_v27  ;;  %v2230_v21 = vld [vmem:[%s3279_s1 + $0x1a8] sm:$0xff]  ;;  %vm3295_vm5 = vmneg %vm2727_vm10  ;;  %v2959_v27 = vpack.c.bf16 %v2745_v0, %v2732_v55 }
  0x28   : > { %834 = vmatpush.bf16.msra.mxu0 %v2177_v44  ;;  %2298 = vmatpush.bf16.msra.mxu1 %v2177_v44  ;;  %v2188_v44 = vld [vmem:[%s3279_s1 + $0x58] sm:$0xff] }
  0x29   : > { %892 = vmatpush.bf16.msra.mxu2 %v2193_v49  ;;  %v2844_v36 = vmax.f32 %v315_v34, 0.0  ;;  %v2212_v49 = vld [vmem:[%s3279_s1 + $0x118] sm:$0xff]  ;;  %v2209_v34 = vld [vmem:[%s3279_s1 + $0x100] sm:$0xff] }
  0x2a   : > { %1158 = vmatpush.bf16.msra.mxu3 %v2201_v56  ;;  %v561_v56 = vrot.slane %v2681_v31, 1 }
  0x2b   : > { %2321 = vmatmul.msk.bf16.vlgmr.msra.gmra.mxu0 %vm2319_vm0, %v2320_v13  ;;  %2326 = vmatmul.msk.bf16.vlgmr.msra.gmra.mxu1 %vm2792_vm13, %v2798_v30  ;;  %vm3333_vm0 = vcmask 1046528   ;;  %337 = vst [vmem:[#allocation2 + $0xc0] sm:$0xff] %v2844_v36  ;;  %v2237_v13 = vld [vmem:[%s3279_s1 + $0x1e0] sm:$0xff]  ;;  %v1296_v26 = vpack.c.bf16 0.0, %v2844_v36 }
  0x2c   : > { %856 = vmatpush.bf16.msrb.mxu1 %v2192_v51  ;;  %1180 = vmatpush.bf16.msrb.mxu0 %v2216_v57  ;;  %v2804_v45 = vsel %vm3333_vm0, %v555_v42, %v557_v4  ;;  %vm3334_vm14 = vmmov %vm3333_vm0  ;;  %v2213_v42 = vld [vmem:[%s3279_s1 + $0x120] sm:$0xff]  ;;  %v563_v57 = vrot.slane %v2844_v36, 1 }
  0x2d   : > { %v2807_v15 = vsel %vm3334_vm14, %v557_v4, %v559_v7  ;;  %2330 = vmatmul.msk.bf16.vlgmr.msra.gmra.mxu2 %vm2328_vm12, %v2329_v23  ;;  %vm2331_vm14 = vmneg %vm2624_vm4  ;;  %v2229_v51 = vld [vmem:[%s3279_s1 + $0x1a0] sm:$0xff]  ;;  %vm2875_vm12 = vcmp.eq.s32.totalorder %v393_v40, 7  ;;  %v2211_v40 = vld [vmem:[%s3279_s1 + $0x110] sm:$0xff]  ;;  %v2404_v38 = vpack.c.bf16 %v2804_v45, %v2745_v0 }
  0x2e   : > { %1520 = vmatpush.bf16.msrb.mxu3 %v2240_v1  ;;  %vm3335_vm0 = vmneg %vm2547_vm1  ;;  %1491 = vmatpush.bf16.msrb.mxu2 %v2232_v11  ;;  %vm2869_vm1 = vcmp.eq.s32.totalorder %v386_v39, 7  ;;  %v2891_v39 = vadd.s32 56, %v2503_v6 }
  0x2f   : > { %vm2333_vm15 = vmpackc.low %vm2331_vm14, %vm3335_vm0 }
  0x30   : > { %857 = vmatpush.bf16.msrb.mxu1 %v2191_v3  ;;  %2335 = vmatmul.msk.bf16.vlgmr.msra.gmra.mxu3 %vm2333_vm15, %v2334_v28  ;;  %v3338_v3 = vmov 0  ;;  %vm3340_vm15 = vcmask 1046528   ;;  %vm3296_vm4 = vmneg %vm2721_vm9  ;;  %v400_v23 = vand.u32 7, %v2891_v39 }
  0x31   : > { %1181 = vmatpush.bf16.msrb.mxu0 %v2215_v8  ;;  %v3339_v3 = vsel %vm2875_vm12, 4294967295, %v3338_v3  ;;  %v2880_v4 = vsel %vm3340_vm15, %v559_v7, %v561_v56  ;;  %vm3341_vm0 = vmmov %vm3340_vm15  ;;  %v2228_v7 = vld [vmem:[%s3279_s1 + $0x198] sm:$0xff] }
  0x32   : > { %1521 = vmatpush.bf16.msrb.mxu3 %v2239_v24  ;;  %1492 = vmatpush.bf16.msrb.mxu2 %v2231_v19  ;;  %v2885_v8 = vsel %vm3341_vm0, %v561_v56, %v563_v57  ;;  %v459_v33 = vld [vmem:[#allocation2 + $0xc0] sm:$0x7f]  ;;  %vm3297_vm15 = vmneg %vm2653_vm6  ;;  %v2247_v56 = vld [vmem:[%s3279_s1 + $0x230] sm:$0xff]  ;;  %v2418_v0 = vpack.c.bf16 %v2880_v4, %v2807_v15 }
  0x33   : > { %v501_v11 = vrot.slane %v459_v33, 7  ;;  %vm2907_vm0 = vmpackc.low %vm3297_vm15, %vm2331_vm14  ;;  %v2185_v19 = vld [vmem:[%s3279_s1 + $0x40] sm:$0xff]  ;;  %v2222_v33 = vld [vmem:[%s3279_s1 + $0x168] sm:$0xff] }
  0x34   : > { %858 = vmatpush.bf16.msrb.mxu1 %v2190_v32  ;;  %vm2928_vm14 = vmpackc.low %vm3295_vm5, %vm3296_vm4  ;;  %v2354_v32 = vpack.c.bf16 %v2651_v17, %v2658_v22  ;;  %v2227_v17 = vld [vmem:[%s3279_s1 + $0x190] sm:$0xff]  ;;  %v2236_v22 = vld [vmem:[%s3279_s1 + $0x1d8] sm:$0xff] }
  0x35   : > { %1182 = vmatpush.bf16.msrb.mxu0 %v2214_v18  ;;  %v3345_v62 = vsel %vm2928_vm14, 4294967295, %v3344_v62  ;;  %vm3299_vm5 = vmneg %vm2740_vm11  ;;  %v2186_v18 = vld [vmem:[%s3279_s1 + $0x48] sm:$0xff] }
  0x36   : > { %1522 = vmatpush.bf16.msrb.mxu3 %v2238_v2  ;;  %1493 = vmatpush.bf16.msrb.mxu2 %v2230_v21  ;;  %vm3300_vm4 = vmneg %vm2691_vm8  ;;  %v2224_v2 = vld [vmem:[%s3279_s1 + $0x178] sm:$0xff]  ;;  %v2235_v21 = vld [vmem:[%s3279_s1 + $0x1d0] sm:$0xff] }
  0x37   : > { %vm2953_vm15 = vmpackc.low %vm3299_vm5, %vm3300_vm4 }
  0x38   : > { %859 = vmatpush.bf16.msrb.mxu1 %v2189_v41  ;;  %vm3349_vm5 = vmneg %vm2653_vm6  ;;  %v2248_v41 = vld [vmem:[%s3279_s1 + $0x238] sm:$0xff]  ;;  %vm3354_vm6 = vnez %v3328_v60 }
  0x39   : > { %1183 = vmatpush.bf16.msrb.mxu0 %v2213_v42  ;;  %vm3350_vm4 = vmneg %vm2574_vm2  ;;  %v2226_v42 = vld [vmem:[%s3279_s1 + $0x188] sm:$0xff]  ;;  %vm3353_vm2 = vnez %v3330_v10 }
  0x3a   : > { %1494 = vmatpush.bf16.msrb.mxu2 %v2229_v51  ;;  %vm2353_vm11 = vmpackc.low %vm3350_vm4, %vm3349_vm5  ;;  %1523 = vmatpush.bf16.msrb.mxu3 %v2237_v13  ;;  %v947_v51 = vpack.c.bf16 %v2611_v54, %v2594_v47  ;;  %v3072_v13 = vpack.c.bf16 %v2681_v31, %v2679_v29 }
  0x3b   : > { %2340 = vmatmul.msk.bf16.gmra.mxu0 %vm2907_vm0, %v2913_v16  ;;  %2345 = vmatmul.msk.bf16.gmra.mxu1 %vm2928_vm14, %v2934_v14  ;;  %vm3348_vm14 = vcmask 1040384   ;;  %vm3303_vm5 = vmneg %vm3353_vm2 }
  0x3c   : > { %860 = vmatpush.bf16.msrb.mxu1 %v2188_v44  ;;  %v2967_v28 = vsel %vm3348_vm14, %v499_v37, %v501_v11  ;;  %vm2982_vm14 = vcmp.eq.s32.totalorder %v400_v23, 0  ;;  %v2223_v44 = vld [vmem:[%s3279_s1 + $0x170] sm:$0xff]  ;;  %vm3357_vm2 = vmneg %vm2600_vm3  ;;  %v2364_v11 = vpack.c.bf16 %v2706_v43, %v2667_v25  ;;  %v2245_v25 = vld [vmem:[%s3279_s1 + $0x220] sm:$0xff] }
  0x3d   : > { %1184 = vmatpush.bf16.msrb.mxu0 %v2212_v49  ;;  %2350 = vmatmul.msk.bf16.gmra.mxu2 %vm2953_vm15, %v2959_v27  ;;  %v624_v49 = vpack.c.bf16 %v2594_v47, %v2442_v5  ;;  %v2234_v5 = vld [vmem:[%s3279_s1 + $0x1c8] sm:$0xff]  ;;  %v953_v47 = vpack.c.bf16 %v2679_v29, %v2622_v61  ;;  %v3054_v61 = vpack.c.bf16 %v2807_v15, %v2804_v45  ;;  %v2220_v29 = vld [vmem:[%s3279_s1 + $0x158] sm:$0xff]  ;;  %vm3306_vm3 = vmneg %vm2875_vm12  ;;  %v2413_v46 = vpack.c.bf16 0.0, %v2967_v28 }
  0x3e   : > { %1495 = vmatpush.bf16.msrb.mxu2 %v2228_v7  ;;  %1524 = vmatpush.bf16.msrb.mxu3 %v2236_v22  ;;  %v2246_v7 = vld [vmem:[%s3279_s1 + $0x228] sm:$0xff]  ;;  %v2244_v43 = vld [vmem:[%s3279_s1 + $0x218] sm:$0xff]  ;;  %v2243_v22 = vld [vmem:[%s3279_s1 + $0x210] sm:$0xff] }
  0x40   : > { %861 = vmatpush.bf16.msrb.mxu1 %v2187_v9  ;;  %2355 = vmatmul.msk.bf16.gmra.mxu3 %vm2353_vm11, %v2354_v32  ;;  %v2225_v9 = vld [vmem:[%s3279_s1 + $0x180] sm:$0xff]  ;;  %vm3304_vm11 = vmneg %vm3354_vm6 }
  0x41   : > { %1185 = vmatpush.bf16.msrb.mxu0 %v2211_v40  ;;  %vm3048_vm4 = vmpackc.low %vm3303_vm5, %vm3304_vm11  ;;  %v2221_v32 = vld [vmem:[%s3279_s1 + $0x160] sm:$0xff] }
  0x42   : > { %1496 = vmatpush.bf16.msrb.mxu2 %v2227_v17  ;;  %1525 = vmatpush.bf16.msrb.mxu3 %v2235_v21  ;;  %vm3358_vm5 = vmneg %vm2721_vm9  ;;  %v2218_v17 = vld [vmem:[%s3279_s1 + $0x148] sm:$0xff] }
  0x43   : > { %vm2363_vm11 = vmpackc.low %vm3358_vm5, %vm3357_vm2 }
  0x44   : > { %862 = vmatpush.bf16.msrb.mxu1 %v2186_v18  ;;  %v627_v18 = vpack.c.bf16 %v2617_v58, %v2611_v54  ;;  %vm2367_vm9 = vmneg %vm2869_vm1  ;;  %vm3374_vm1 = vnez %v3339_v3 }
  0x45   : > { %1186 = vmatpush.bf16.msrb.mxu0 %v2210_v35  ;;  %v950_v35 = vpack.c.bf16 %v2619_v59, %v2617_v58  ;;  %vm3109_vm2 = vmpackc.low %vm3306_vm3, %vm2367_vm9  ;;  %v2369_v58 = vpack.c.bf16 %v2885_v8, %v2880_v4  ;;  %v2374_v59 = vpack.c.bf16 %v2967_v28, %v2711_v48  ;;  %v2241_v48 = vld [vmem:[%s3279_s1 + $0x200] sm:$0xff]  ;;  %vm3367_vm3 = vnez %v3345_v62 }
  0x46   : > { %1497 = vmatpush.bf16.msrb.mxu2 %v2226_v42  ;;  %1526 = vmatpush.bf16.msrb.mxu3 %v2234_v5  ;;  %vm2371_vm5 = vmneg %vm2982_vm14 }
  0x48   : > { %863 = vmatpush.bf16.msrb.mxu1 %v2185_v19  ;;  %v2217_v19 = vld [vmem:[%s3279_s1 + $0x140] sm:$0xff] }
  0x49   : > { %1187 = vmatpush.bf16.msrb.mxu0 %v2209_v34  ;;  %v956_v34 = vpack.c.bf16 %v2844_v36, %v2681_v31 }
  0x4a   : > { %1498 = vmatpush.bf16.msrb.mxu2 %v2225_v9  ;;  %1527 = vmatpush.bf16.msrb.mxu3 %v2233_v50 }
  0x4b   : > { %864 = vmatmul.bf16.vlgmr.msrb.gmra.mxu1 %v624_v49 }
  0x4c   : > { %1209 = vmatpush.bf16.msra.mxu1 %v2224_v2  ;;  %1188 = vmatmul.bf16.vlgmr.msrb.gmra.mxu0 %v947_v51  ;;  %v529_v2 = vld [vmem:[#allocation2 + $0x80] sm:$0x1] }
  0x4d   : > { %1549 = vmatpush.bf16.msra.mxu0 %v2248_v41  ;;  %2360 = vmatmul.msk.bf16.gmra.mxu2 %vm3048_vm4, %v3054_v61 }
  0x4e   : > { %2299 = vmatpush.bf16.msra.mxu2 %v2248_v41 }
  0x50   : > { %1210 = vmatpush.bf16.msra.mxu1 %v2223_v44  ;;  %2365 = vmatmul.msk.bf16.gmra.mxu3 %vm2363_vm11, %v2364_v11  ;;  %vm3361_vm11 = vmneg %vm2727_vm10  ;;  %vm3152_vm10 = vcmp.eq.s32.totalorder %v400_v23, 7 }
  0x51   : > { %1550 = vmatpush.bf16.msra.mxu0 %v2247_v56  ;;  %vm2373_vm12 = vmpackc.low %vm2371_vm5, %vm3361_vm11 }
  0x52   : > { %2300 = vmatpush.bf16.msra.mxu2 %v2247_v56  ;;  %vm2425_vm14 = vmneg %vm3152_vm10 }
  0x54   : > { %1211 = vmatpush.bf16.msra.mxu1 %v2222_v33 }
  0x55   : > { %1551 = vmatpush.bf16.msra.mxu0 %v2246_v7 }
  0x56   : > { %2301 = vmatpush.bf16.msra.mxu2 %v2246_v7 }
  0x58   : > { %1212 = vmatpush.bf16.msra.mxu1 %v2221_v32 }
  0x59   : > { %1552 = vmatpush.bf16.msra.mxu0 %v2245_v25 }
  0x5a   : > { %2302 = vmatpush.bf16.msra.mxu2 %v2245_v25 }
  0x5b   : > { %869 = vmatmul.bf16.gmra.mxu1 %v627_v18 }
  0x5c   : > { %1213 = vmatpush.bf16.msra.mxu1 %v2220_v29  ;;  %1193 = vmatmul.bf16.gmra.mxu0 %v950_v35 }
  0x5d   : > { %1553 = vmatpush.bf16.msra.mxu0 %v2244_v43  ;;  %2370 = vmatmul.msk.bf16.gmra.mxu2 %vm3109_vm2, %v2369_v58 }
  0x5e   : > { %2303 = vmatpush.bf16.msra.mxu2 %v2244_v43 }
  0x60   : > { %1214 = vmatpush.bf16.msra.mxu1 %v2219_v52  ;;  %2375 = vmatmul.msk.bf16.gmra.mxu3 %vm2373_vm12, %v2374_v59  ;;  %vm3364_vm12 = vcmask 1046528  }
  0x61   : > { %1554 = vmatpush.bf16.msra.mxu0 %v2243_v22 }
  0x62   : > { %2304 = vmatpush.bf16.msra.mxu2 %v2243_v22 }
  0x64   : > { %1215 = vmatpush.bf16.msra.mxu1 %v2218_v17 }
  0x65   : > { %1555 = vmatpush.bf16.msra.mxu0 %v2242_v53 }
  0x66   : > { %2305 = vmatpush.bf16.msra.mxu2 %v2242_v53 }
  0x68   : > { %1216 = vmatpush.bf16.msra.mxu1 %v2217_v19 }
  0x69   : > { %1556 = vmatpush.bf16.msra.mxu0 %v2241_v48 }
  0x6a   : > { %2306 = vmatpush.bf16.msra.mxu2 %v2241_v48 }
  0x6b   : > { %874 = vmatmul.bf16.gmra.mxu1 %v2988_v20 }
  0x6c   : > { %1198 = vmatmul.bf16.gmra.mxu0 %v953_v47 }
  0x6d   : > { %2380 = vmatmul.msk.bf16.vlgmr.msrb.gmra.mxu2 %vm2907_vm0, %v2913_v16  ;;  %v565_v16 = vrot.slane %v529_v2, 1  ;;  %vm3365_vm0 = vmneg %vm2671_vm7  ;;  %vm3368_vm7 = vnez %v3326_v63 }
  0x6f   : > { %v566_v31 = vsel %vm3364_vm12, %v563_v57, %v565_v16  ;;  %vm3370_vm12 = vmneg %vm3354_vm6  ;;  %vm3372_vm6 = vnez %v3330_v10 }
  0x70   : > { %1528 = vmatmul.bf16.vlgmr.msrb.gmra.mxu3 %v627_v18  ;;  %v2427_v60 = vpack.c.bf16 0.0, %v566_v31  ;;  %v2432_v15 = vpack.c.bf16 %v566_v31, %v2885_v8 }
  0x7b   : > { %879 = vmatmul.bf16.gmra.mxu1 %v3072_v13 }
  0x7c   : > { %1203 = vmatmul.bf16.gmra.mxu0 %v956_v34 }
  0x7d   : > { %2385 = vmatmul.msk.bf16.gmra.mxu2 %vm2792_vm13, %v2798_v30  ;;  %vm3366_vm13 = vmneg %vm2691_vm8 }
  0x7e   : > { %vm2388_vm11 = vmpackc.low %vm3366_vm13, %vm3365_vm0 }
  0x7f   : > { %vm3369_vm8 = vmneg %vm3368_vm7 }
  0x80   : > { %1533 = vmatmul.bf16.gmra.mxu3 %v2988_v20  ;;  %vm2403_vm0 = vmpackc.low %vm3370_vm12, %vm3369_vm8 }
  0x81   : > { %vm3373_vm13 = vmneg %vm3372_vm6 }
  0x8b   : > { %2390 = vmatmul.msk.bf16.vlgmr.msra.gmra.mxu1 %vm2388_vm11, %v2389_v12  ;;  %vm2417_vm11 = vmpackc.low %vm2367_vm9, %vm3373_vm13 }
  0x8c   : > { %2395 = vmatmul.msk.bf16.vlgmr.msra.gmra.mxu0 %vm2953_vm15, %v2959_v27  ;;  %vm3371_vm15 = vmmov 1   ;;  %vm3375_vm9 = vmneg %vm3374_vm1 }
  0x8d   : > { %2400 = vmatmul.msk.bf16.gmra.mxu2 %vm3367_vm3, %v2934_v14  ;;  %vm2412_vm3 = vmpackc.low %vm3371_vm15, %vm2371_vm5 }
  0x90   : > { %1538 = vmatmul.bf16.gmra.mxu3 %v3072_v13 }
  0x9b   : > { %2405 = vmatmul.msk.bf16.gmra.mxu1 %vm2403_vm0, %v2404_v38 }
  0x9c   : > { %2410 = vmatmul.msk.bf16.gmra.mxu0 %vm3048_vm4, %v3054_v61  ;;  %vm2426_vm4 = vmpackc.low %vm3371_vm15, %vm2425_vm14 }
  0x9d   : > { %2414 = vmatmul.msk.bf16.gmra.mxu2 %vm2412_vm3, %v2413_v46 }
  0xa0   : > { %1543 = vmatmul.bf16.gmra.mxu3 %v1296_v26 }
  0xa8   : > { %v836_v55 = vpop.f32.mrf.mxu0  ;;  %v846_v63 = vpop.f32.mrf.mxu1 }
  0xab   : > { %2419 = vmatmul.msk.bf16.gmra.mxu1 %vm2417_vm11, %v2418_v0 }
  0xac   : > { %2424 = vmatmul.msk.bf16.gmra.mxu0 %vm3109_vm2, %v2369_v58  ;;  %vm2431_vm2 = vmpackc.low %vm2425_vm14, %vm3375_vm9 }
  0xad   : > { %2428 = vmatmul.msk.bf16.vlgmr.msra.gmra.mxu2 %vm2426_vm4, %v2427_v60 }
  0xb0   : > { %v894_v10 = vpop.f32.mrf.mxu2  ;;  %v838_v30 = vpop.f32.mrf.mxu0 }
  0xb1   : > { %v848_v45 = vpop.f32.mrf.mxu1 }
  0xb3   : > { %v1160_v36 = vpop.f32.mrf.mxu3 }
  0xb8   : > { %v896_v57 = vpop.f32.mrf.mxu2  ;;  %v841_v1 = vpop.f32.mrf.mxu0 }
  0xb9   : > { %v851_v39 = vpop.f32.mrf.mxu1 }
  0xbb   : > { %v3204_v62 = vpop.f32.mrf.mxu3  ;;  %2433 = vmatmul.msk.bf16.gmra.mxu1 %vm2431_vm2, %v2432_v15 }
  0xc0   : > { %v899_v4 = vpop.f32.mrf.mxu2  ;;  %v843_v14 = vpop.f32.mrf.mxu0 }
  0xc1   : > { %v853_v23 = vpop.f32.mrf.mxu1 }
  0xc3   : > { %v1165_v24 = vpop.f32.mrf.mxu3 }
  0xc8   : > { %v901_v27 = vpop.f32.mrf.mxu2 }
  0xc9   : > { %v865_v28 = vpop.f32.mrf.mxu1  ;;  %v1189_v37 = vpop.f32.mrf.mxu0 }
  0xca   : > { %v866_v20 = vadd.f32 %v865_v28, %v836_v55  ;;  %v1190_v41 = vadd.f32 %v1189_v37, %v1160_v36 }
  0xcb   : > { %v3210_v42 = vpop.f32.mrf.mxu3 }
  0xcc   : > { %v895_v21 = vadd.f32 %v894_v10, %v866_v20 }
  0xd0   : > { %v904_v44 = vpop.f32.mrf.mxu2 }
  0xd1   : > { %v867_v49 = vpop.f32.mrf.mxu1  ;;  %v1191_v3 = vpop.f32.mrf.mxu0 }
  0xd2   : > { %v868_v51 = vadd.f32 %v867_v49, %v838_v30 }
  0xd3   : > { %v1170_v56 = vpop.f32.mrf.mxu3 }
  0xd4   : > { %v897_v9 = vadd.f32 %v896_v57, %v868_v51 }
  0xd8   : > { %v906_v8 = vpop.f32.mrf.mxu2 }
  0xd9   : > { %v870_v33 = vpop.f32.mrf.mxu1  ;;  %v1194_v5 = vpop.f32.mrf.mxu0 }
  0xda   : > { %v871_v47 = vadd.f32 %v870_v33, %v841_v1  ;;  %v3212_v40 = vadd.f32 %v1194_v5, %v1165_v24 }
  0xdb   : > { %v3214_v61 = vpop.f32.mrf.mxu3 }
  0xdc   : > { %v3216_v7 = vadd.f32 %v899_v4, %v871_v47 }
  0xe0   : > { %v909_v11 = vpop.f32.mrf.mxu2 }
  0xe1   : > { %v872_v13 = vpop.f32.mrf.mxu1  ;;  %v3218_v32 = vpop.f32.mrf.mxu0 }
  0xe2   : > { %v873_v50 = vadd.f32 %v872_v13, %v843_v14 }
  0xe3   : > { %v1175_v29 = vpop.f32.mrf.mxu3 }
  0xe4   : > { %v3220_v25 = vadd.f32 %v901_v27, %v873_v50 }
  0xe8   : > { %v911_v43 = vpop.f32.mrf.mxu2 }
  0xe9   : > { %v875_v52 = vpop.f32.mrf.mxu1  ;;  %v1199_v18 = vpop.f32.mrf.mxu0 }
  0xea   : > { %v876_v35 = vadd.f32 %v875_v52, %v846_v63  ;;  %v3222_v17 = vadd.f32 %v1199_v18, %v1170_v56 }
  0xeb   : > { %v3226_v58 = vpop.f32.mrf.mxu3 }
  0xec   : > { %v3224_v54 = vadd.f32 %v904_v44, %v876_v35 }
  0xf0   : > { %v1500_v59 = vpop.f32.mrf.mxu2 }
  0xf1   : > { %v877_v22 = vpop.f32.mrf.mxu1  ;;  %v3228_v19 = vpop.f32.mrf.mxu0 }
  0xf2   : > { %v878_v53 = vadd.f32 %v877_v22, %v848_v45 }
  0xf3   : > { %v1529_v34 = vpop.f32.mrf.mxu3 }
  0xf4   : > { %v3230_v48 = vadd.f32 %v906_v8, %v878_v53  ;;  %v1530_v15 = vadd.f32 %v1529_v34, %v1500_v59 }
  0xf8   : > { %v1502_v2 = vpop.f32.mrf.mxu2 }
  0xf9   : > { %v880_v6 = vpop.f32.mrf.mxu1  ;;  %v1204_v16 = vpop.f32.mrf.mxu0 }
  0xfa   : > { %v881_v31 = vadd.f32 %v880_v6, %v851_v39  ;;  %v3232_v12 = vadd.f32 %v1204_v16, %v1175_v29  ;;  %v1192_v39 = vadd.f32 %v1191_v3, %v3204_v62  ;;  %v1197_v29 = vadd.f32 %v3218_v32, %v3210_v42 }
  0xfb   : > { %v1531_v63 = vpop.f32.mrf.mxu3 }
  0xfc   : > { %v3234_v26 = vadd.f32 %v909_v11, %v881_v31  ;;  %v1532_v27 = vadd.f32 %v1531_v63, %v1502_v2 }
 0x100   : > { %v1505_v38 = vpop.f32.mrf.mxu2 }
 0x101   : > { %v882_v46 = vpop.f32.mrf.mxu1  ;;  %v3236_v55 = vpop.f32.mrf.mxu0 }
 0x102   : > { %v883_v0 = vadd.f32 %v882_v46, %v853_v23 }
 0x103   : > { %v1534_v57 = vpop.f32.mrf.mxu3 }
 0x104   : > { %v3238_v60 = vadd.f32 %v911_v43, %v883_v0  ;;  %v1535_v5 = vadd.f32 %v1534_v57, %v1505_v38 }
 0x108   : > { %v1507_v10 = vpop.f32.mrf.mxu2 }
 0x109   : > { %v1218_v30 = vpop.f32.mrf.mxu1  ;;  %v1558_v45 = vpop.f32.mrf.mxu0 }
 0x10a   : > { %v1219_v36 = vadd.f32 %v1218_v30, %v1190_v41  ;;  %v1559_v28 = vadd.f32 %v1558_v45, %v1530_v15 }
 0x10b   : > { %v1536_v49 = vpop.f32.mrf.mxu3 }
 0x10c   : > { %v1246_v1 = vadd.f32 %v1219_v36, %v895_v21  ;;  %v1537_v22 = vadd.f32 %v1536_v49, %v1507_v10 }
 0x10e   : > { %v1586_v20 = vadd.f32 %v1559_v28, %v1246_v1 }
 0x110   : > { %v1510_v4 = vpop.f32.mrf.mxu2  ;;  %v1640_v62 = vmul.f32 %v1586_v20, %v1586_v20 }
 0x111   : > { %v1220_v14 = vpop.f32.mrf.mxu1  ;;  %v1560_v24 = vpop.f32.mrf.mxu0 }
 0x112   : > { %v1221_v37 = vadd.f32 %v1220_v14, %v1192_v39  ;;  %v1561_v44 = vadd.f32 %v1560_v24, %v1532_v27 }
 0x113   : > { %v1539_v43 = vpop.f32.mrf.mxu3 }
 0x114   : > { %v1247_v23 = vadd.f32 %v1221_v37, %v897_v9  ;;  %v1540_v42 = vadd.f32 %v1539_v43, %v1510_v4 }
 0x116   : > { %v1587_v51 = vadd.f32 %v1561_v44, %v1247_v23 }
 0x118   : > { %v2268_v41 = vpack.c.bf16 %v1587_v51, %v1586_v20  ;;  %v1626_v21 = vadd.f32 %v1587_v51, %v1586_v20  ;;  %v1641_v3 = vmul.f32 %v1587_v51, %v1587_v51  ;;  %v1512_v56 = vpop.f32.mrf.mxu2 }
 0x119   : > { %v1223_v8 = vpop.f32.mrf.mxu1  ;;  %v1563_v33 = vpop.f32.mrf.mxu0 }
 0x11a   : > { %2269 = vst [vmem:[%s3246_s14] sm:$0xff] %v2268_v41   ;;  %v1648_v9 = vadd.f32 %v1641_v3, %v1640_v62  ;;  %v1224_v47 = vadd.f32 %v1223_v8, %v3212_v40  ;;  %v1564_v13 = vadd.f32 %v1563_v33, %v1535_v5 }
 0x11b   : > { %v1541_v30 = vpop.f32.mrf.mxu3 }
 0x11c   : > { %v1248_v11 = vadd.f32 %v1224_v47, %v3216_v7  ;;  %v1542_v24 = vadd.f32 %v1541_v30, %v1512_v56 }
 0x11e   : > { %v1588_v50 = vadd.f32 %v1564_v13, %v1248_v11 }
 0x120   : > { %v1627_v52 = vadd.f32 %v1626_v21, %v1588_v50  ;;  %v1642_v18 = vmul.f32 %v1588_v50, %v1588_v50  ;;  %v1515_v2 = vpop.f32.mrf.mxu2 }
 0x121   : > { %v1225_v35 = vpop.f32.mrf.mxu1  ;;  %v1565_v59 = vpop.f32.mrf.mxu0 }
 0x122   : > { %v1649_v53 = vadd.f32 %v1648_v9, %v1642_v18  ;;  %v1226_v34 = vadd.f32 %v1225_v35, %v1197_v29  ;;  %v1566_v40 = vadd.f32 %v1565_v59, %v1537_v22 }
 0x123   : > { %v1544_v37 = vpop.f32.mrf.mxu3 }
 0x124   : > { %v1249_v6 = vadd.f32 %v1226_v34, %v3220_v25  ;;  %v1202_v25 = vadd.f32 %v3228_v19, %v3214_v61  ;;  %v1545_v62 = vadd.f32 %v1544_v37, %v1515_v2 }
 0x126   : > { %v1589_v16 = vadd.f32 %v1566_v40, %v1249_v6 }
 0x128   : > { %v2273_v7 = vpack.c.bf16 %v1589_v16, %v1588_v50  ;;  %v1628_v31 = vadd.f32 %v1627_v52, %v1589_v16  ;;  %v1643_v38 = vmul.f32 %v1589_v16, %v1589_v16  ;;  %v1517_v36 = vpop.f32.mrf.mxu2 }
 0x129   : > { %v1228_v46 = vpop.f32.mrf.mxu1  ;;  %v1568_v63 = vpop.f32.mrf.mxu0 }
 0x12a   : > { %2288 = vst [vmem:[%s3246_s14 + $0x8] sm:$0xff] %v2273_v7   ;;  %v1650_v32 = vadd.f32 %v1649_v53, %v1643_v38  ;;  %v1229_v0 = vadd.f32 %v1228_v46, %v3222_v17  ;;  %v1569_v45 = vadd.f32 %v1568_v63, %v1540_v42 }
 0x12b   : > { %v1546_v56 = vpop.f32.mrf.mxu3 }
 0x12c   : > { %v1250_v10 = vadd.f32 %v1229_v0, %v3224_v54  ;;  %v1547_v47 = vadd.f32 %v1546_v56, %v1517_v36 }
 0x12e   : > { %v1590_v57 = vadd.f32 %v1569_v45, %v1250_v10 }
 0x130   : > { %v1629_v1 = vadd.f32 %v1628_v31, %v1590_v57  ;;  %v1644_v39 = vmul.f32 %v1590_v57, %v1590_v57  ;;  %v1573_v54 = vpop.f32.mrf.mxu2 }
 0x131   : > { %v1230_v15 = vpop.f32.mrf.mxu1  ;;  %v1570_v14 = vpop.f32.mrf.mxu0  ;;  %v1574_v41 = vadd.f32 %v1573_v54, %v1545_v62 }
 0x132   : > { %v1651_v4 = vadd.f32 %v1650_v32, %v1644_v39  ;;  %v1231_v27 = vadd.f32 %v1230_v15, %v1202_v25  ;;  %v1571_v17 = vadd.f32 %v1570_v14, %v1542_v24 }
 0x134   : > { %v1251_v28 = vadd.f32 %v1231_v27, %v3230_v48  ;;  %v1207_v48 = vadd.f32 %v3236_v55, %v3226_v58 }
 0x136   : > { %v1591_v20 = vadd.f32 %v1571_v17, %v1251_v28 }
 0x138   : > { %v2278_v23 = vpack.c.bf16 %v1591_v20, %v1590_v57  ;;  %v1630_v44 = vadd.f32 %v1629_v1, %v1591_v20  ;;  %v1645_v49 = vmul.f32 %v1591_v20, %v1591_v20  ;;  %v1575_v5 = vpop.f32.mrf.mxu2 }
 0x139   : > { %v1233_v51 = vpop.f32.mrf.mxu1  ;;  %v1576_v50 = vadd.f32 %v1575_v5, %v1547_v47 }
 0x13a   : > { %2289 = vst [vmem:[%s3246_s14 + $0x10] sm:$0xff] %v2278_v23   ;;  %v1652_v61 = vadd.f32 %v1651_v4, %v1645_v49  ;;  %v1234_v19 = vadd.f32 %v1233_v51, %v3232_v12 }
 0x13c   : > { %v1252_v21 = vadd.f32 %v1234_v19, %v3234_v26 }
 0x13e   : > { %v1592_v3 = vadd.f32 %v1574_v41, %v1252_v21 }
 0x140   : > { %v1631_v8 = vadd.f32 %v1630_v44, %v1592_v3  ;;  %v1646_v33 = vmul.f32 %v1592_v3, %v1592_v3 }
 0x141   : > { %v1235_v9 = vpop.f32.mrf.mxu1 }
 0x142   : > { %v1653_v11 = vadd.f32 %v1652_v61, %v1646_v33  ;;  %v1236_v13 = vadd.f32 %v1235_v9, %v1207_v48 }
 0x144   : > { %v1253_v12 = vadd.f32 %v1236_v13, %v3238_v60 }
 0x146   : > { %v1593_v29 = vadd.f32 %v1576_v50, %v1253_v12 }
 0x148   : > { %v2283_v26 = vpack.c.bf16 %v1593_v29, %v1592_v3  ;;  %v1632_v43 = vadd.f32 %v1631_v8, %v1593_v29  ;;  %v1647_v52 = vmul.f32 %v1593_v29, %v1593_v29 }
 0x14a   : > { %2290 = vst [vmem:[%s3246_s14 + $0x18] sm:$0xff] %v2283_v26   ;;  %v1633_v18 = vrot.slane %v1632_v43, 4  ;;  %v1654_v35 = vadd.f32 %v1653_v11, %v1647_v52 }
 0x14c   : > { %v1634_v58 = vadd.f32 %v1633_v18, %v1632_v43  ;;  %v1655_v55 = vrot.slane %v1654_v35, 4 }
 0x14e   : > { %v1635_v59 = vrot.slane %v1634_v58, 2  ;;  %v1656_v22 = vadd.f32 %v1655_v55, %v1654_v35 }
 0x150   : > { %v1636_v53 = vadd.f32 %v1635_v59, %v1634_v58  ;;  %v1657_v34 = vrot.slane %v1656_v22, 2 }
 0x152   : > { %v1637_v2 = vrot.slane %v1636_v53, 1  ;;  %v1658_v6 = vadd.f32 %v1657_v34, %v1656_v22 }
 0x154   : > { %v1638_v60 = vadd.f32 %v1637_v2, %v1636_v53  ;;  %v1659_v40 = vrot.slane %v1658_v6, 1 }
 0x156   : > { %1639 = vst [vmem:[%s271_s16] sm:$0xff] %v1638_v60  ;;  %v1660_v16 = vadd.f32 %v1659_v40, %v1658_v6 }
 0x158   : > { %1661 = vst [vmem:[%s275_s19] sm:$0xff] %v1660_v16 }
 0x159 PF: > { %s17_s21 = sadd.s32 1, %s2440_s21  }
 0x15a   : > { %p14_p5 = scmp.ge.s32.totalorder %s17_s21, 4  }
 0x15c   :  { %16 = sbr.rel (!%p14_p5) target bundleno = 1 (0x1), region = 92 }

</bundles_post_ra>
